<compile_context>
chip_gen: v7x
topology: tpu7x:2x2x1
jax: 0.10.0
libtpu: 0.0.40
codegen_flags: <defaults>
</compile_context>

<pallas_src>
import functools

import jax
import jax.numpy as jnp
import numpy as np
from jax.experimental import pallas as pl
from jax.experimental.pallas import tpu as pltpu

NEG_SLOPE = 0.01   # nn.LeakyReLU default slope
BN_EPS = 1e-5      # nn.BatchNorm1d default eps


def _leaky_relu(y):
    return jnp.where(y > 0, y, NEG_SLOPE * y)


# ---------------------------- fused Pallas kernel ----------------------------
def _encoder_kernel(x_ref, w1_ref, b1_ref, w2_ref, pb2_ref, w3_ref, pb3_ref,
                    wl_ref, bl_ref, o_ref, y1p_ref, y2p_ref, *, Lo1, Lo2, Lo3):
    # ---------- stage 1: Conv1d(1, 8, K=8, s=4, p=2) + LeakyReLU ----------
    # x_ref is the per-sample zero-padded trace, shape (L + 4, 1), position on sublanes.
    acc1 = jnp.zeros((Lo1, 8), jnp.float32)
    for k in range(8):                                   # tap k reads x_pad[i*4 + k]
        tap = x_ref[pl.ds(k, Lo1, stride=4), :]          # (Lo1, 1) strided sublane load
        acc1 = acc1 + tap * w1_ref[k]                    # (Lo1,1)*(1,8) -> (Lo1,8)
    a1 = _leaky_relu(acc1 + b1_ref[...])                 # BN1 folded downstream

    # zero-padded stage-1 activations for the next strided im2col
    y1p_ref[0:1, :] = jnp.zeros((1, 8), jnp.float32)
    y1p_ref[Lo1 + 1:Lo1 + 2, :] = jnp.zeros((1, 8), jnp.float32)
    y1p_ref[1:Lo1 + 1, :] = a1

    # ---------- stage 2: Conv1d(8, 64, K=4, s=2, p=1) + LeakyReLU ----------
    acc2 = jnp.zeros((Lo2, 64), jnp.float32)
    for k in range(4):
        tap = y1p_ref[pl.ds(k, Lo2, stride=2), :]        # (Lo2, 8)
        acc2 = acc2 + jnp.dot(tap, w2_ref[k], preferred_element_type=jnp.float32)
    a2 = _leaky_relu(acc2 + pb2_ref[...])                # pb2 = b2 + BN1-shift term

    y2p_ref[0:1, :] = jnp.zeros((1, 64), jnp.float32)
    y2p_ref[Lo2 + 1:Lo2 + 2, :] = jnp.zeros((1, 64), jnp.float32)
    y2p_ref[1:Lo2 + 1, :] = a2

    # ---------- stage 3: Conv1d(64, 128, K=4, s=2, p=1) + LeakyReLU ----------
    acc3 = jnp.zeros((Lo3, 128), jnp.float32)
    for k in range(4):
        tap = y2p_ref[pl.ds(k, Lo3, stride=2), :]        # (Lo3, 64)
        acc3 = acc3 + jnp.dot(tap, w3_ref[k], preferred_element_type=jnp.float32)
    a3 = _leaky_relu(acc3 + pb3_ref[...])                # pb3 = b3 + BN2-shift term

    # ---------- Linear(128, 128) with BN3 scale/shift folded in ----------
    out = jnp.dot(a3, wl_ref[...], preferred_element_type=jnp.float32) + bl_ref[...]
    o_ref[...] = out.astype(o_ref.dtype)                 # lane-dense (Lo3, 128)


# ---------------------------- one-time parameter folding ----------------------------
def bn_scale_shift(bn):
    gamma, beta, rmean, rvar = bn
    scale = gamma / jnp.sqrt(rvar + BN_EPS)
    shift = beta - rmean * scale
    return scale, shift


def _conv_w(W):
    """torch Conv1d weight (Cout, Cin, K) -> (K, Cin, Cout)."""
    return jnp.transpose(W, (2, 1, 0))


def _pos_bias(w_next, shift_prev, b_next, Lin, Lo, stride, pad):
    """next conv bias + (previous BN shift pushed through the next conv), per output
    position. Exact: with zero padding the shift contributes only through taps that
    land inside the input, which depends only on the static output position."""
    K = w_next.shape[0]
    per_k = jnp.einsum('c,kco->ko', shift_prev, w_next)           # (K, Cout)
    mask = np.zeros((Lo, K), np.float32)
    for i in range(Lo):
        for k in range(K):
            mask[i, k] = 1.0 if 0 <= i * stride + k - pad < Lin else 0.0
    return b_next[None, :] + jnp.asarray(mask) @ per_k             # (Lo, Cout)


def prepare_params(params, L):
    """Host-side folding of conv / BatchNorm(eval) / Linear parameters. Run once."""
    Lo1 = (L + 2 * 2 - 8) // 4 + 1
    Lo2 = (Lo1 + 2 * 1 - 4) // 2 + 1
    Lo3 = (Lo2 + 2 * 1 - 4) // 2 + 1

    w1 = _conv_w(params['w1'])            # (8, 1, 8)
    w2 = _conv_w(params['w2'])            # (4, 8, 64)
    w3 = _conv_w(params['w3'])            # (4, 64, 128)
    s1, t1 = bn_scale_shift(params['bn1'])
    s2, t2 = bn_scale_shift(params['bn2'])
    s3, t3 = bn_scale_shift(params['bn3'])

    # BN1/BN2 scale folded into the next conv's input-channel weights (exact)
    w2_eff = w2 * s1[None, :, None]
    w3_eff = w3 * s2[None, :, None]
    # conv bias + previous-stage BN shift, per output position (exact with zero pad)
    pb2 = _pos_bias(w2, t1, params['b2'], Lo1, Lo2, stride=2, pad=1)
    pb3 = _pos_bias(w3, t2, params['b3'], Lo2, Lo3, stride=2, pad=1)
    # BN3 scale/shift folded into the Linear (exact)
    wl_t = params['wl'].T                                          # (in, out)
    wl_eff = s3[:, None] * wl_t
    bl_eff = (params['bl'] + t3 @ wl_t)[None, :]

    return dict(w1=w1, b1=params['b1'][None, :],
                w2=w2_eff, pb2=pb2, w3=w3_eff, pb3=pb3,
                wl=wl_eff, bl=bl_eff)


# ---------------------------- forward wrapper ----------------------------
def cnn_patch_encoder(x, prep, trace_id=0):
    """Matches CNNPatchEncoder.forward (BatchNorm eval-mode, stats pre-folded)."""
    trace = x[:, :, trace_id] if x.ndim == 5 else x[:, trace_id]   # (B, 1, L)
    B, _, L = trace.shape
    Lo1 = (L + 2 * 2 - 8) // 4 + 1
    Lo2 = (Lo1 + 2 * 1 - 4) // 2 + 1
    Lo3 = (Lo2 + 2 * 1 - 4) // 2 + 1
    Lp = L + 2 * 2
    Cl = prep['wl'].shape[1]

    # (B, 1, L) -> (B, L, 1) is a free reshape; zero-pad the position axis for stage 1.
    xp = jnp.pad(trace.astype(jnp.float32).reshape(B, L, 1),
                 ((0, 0), (2, 2), (0, 0)))                         # (B, Lp, 1)

    kernel = functools.partial(_encoder_kernel, Lo1=Lo1, Lo2=Lo2, Lo3=Lo3)
    rep3 = lambda b: (0, 0, 0)     # grid-invariant 3-D operands (weights)
    rep2 = lambda b: (0, 0)        # grid-invariant 2-D operands (biases)

    out = pl.pallas_call(
        kernel,
        out_shape=jax.ShapeDtypeStruct((B, Lo3, Cl), jnp.float32),
        grid_spec=pltpu.PrefetchScalarGridSpec(
            num_scalar_prefetch=0,
            grid=(B,),
            in_specs=[
                pl.BlockSpec((None, Lp, 1), lambda b: (b, 0, 0)),  # padded trace (per b)
                pl.BlockSpec((8, 1, 8), rep3),                     # w1  (K, Cin, Cout)
                pl.BlockSpec((1, 8), rep2),                        # b1
                pl.BlockSpec((4, 8, 64), rep3),                    # w2  (BN1 scale folded)
                pl.BlockSpec((Lo2, 64), rep2),                     # pb2 (b2 + BN1 shift)
                pl.BlockSpec((4, 64, 128), rep3),                  # w3  (BN2 scale folded)
                pl.BlockSpec((Lo3, 128), rep2),                    # pb3 (b3 + BN2 shift)
                pl.BlockSpec((128, 128), rep2),                    # wl  (BN3 folded)
                pl.BlockSpec((1, 128), rep2),                      # bl  (BN3 folded)
            ],
            out_specs=pl.BlockSpec((None, Lo3, Cl), lambda b: (b, 0, 0)),
            scratch_shapes=[pltpu.VMEM((Lo1 + 2, 8), jnp.float32),    # padded y1
                            pltpu.VMEM((Lo2 + 2, 64), jnp.float32)],  # padded y2
        ),
        compiler_params=pltpu.CompilerParams(
            dimension_semantics=("parallel",)),
    )(xp, prep['w1'], prep['b1'], prep['w2'], prep['pb2'],
      prep['w3'], prep['pb3'], prep['wl'], prep['bl'])
    # torch does transpose(-1,-2) to (B, L, C); rows are already (position, channel).
    return out


# ---------------------------- parameters ----------------------------
def init_params(key):
    ks = jax.random.split(key, 11)

    def conv_p(kw, kb, cout, cin, K):
        fan_in = cin * K
        w = jax.random.normal(kw, (cout, cin, K), jnp.float32) / np.sqrt(fan_in)
        b = 0.05 * jax.random.normal(kb, (cout,), jnp.float32)
        return w, b

    def bn_p(k, c):
        k1, k2, k3, k4 = jax.random.split(k, 4)
        gamma = 1.0 + 0.1 * jax.random.normal(k1, (c,), jnp.float32)
        beta = 0.1 * jax.random.normal(k2, (c,), jnp.float32)
        rmean = 0.1 * jax.random.normal(k3, (c,), jnp.float32)
        rvar = 1.0 + 0.1 * jax.random.uniform(k4, (c,), jnp.float32)
        return gamma, beta, rmean, rvar

    p = {}
    p['w1'], p['b1'] = conv_p(ks[0], ks[1], 8, 1, 8)      # Conv1d(1, 8, 8, 4, 2)
    p['w2'], p['b2'] = conv_p(ks[2], ks[3], 64, 8, 4)     # Conv1d(8, 64, 4, 2, 1)
    p['w3'], p['b3'] = conv_p(ks[4], ks[5], 128, 64, 4)   # Conv1d(64, 128, 4, 2, 1)
    p['bn1'] = bn_p(ks[6], 8)
    p['bn2'] = bn_p(ks[7], 64)
    p['bn3'] = bn_p(ks[8], 128)
    p['wl'] = jax.random.normal(ks[9], (128, 128), jnp.float32) / np.sqrt(128)
    p['bl'] = 0.05 * jax.random.normal(ks[10], (128,), jnp.float32)
    return p


# ---------------------------- pure-JAX reference ----------------------------
def reference(x, params, trace_id=0):
    trace = x[:, :, trace_id] if x.ndim == 5 else x[:, trace_id]

    def conv(h, w, b, s, p):
        y = jax.lax.conv_general_dilated(h, w, (s,), [(p, p)],
                                         dimension_numbers=('NCH', 'OIH', 'NCH'))
        return y + b[None, :, None]

    def lrelu(y):
        return jnp.where(y > 0, y, NEG_SLOPE * y)

    def bn(y, bnp):
        scale, shift = bn_scale_shift(bnp)
        return y * scale[None, :, None] + shift[None, :, None]

    h = trace.astype(jnp.float32)
    h = bn(lrelu(conv(h, params['w1'], params['b1'], 4, 2)), params['bn1'])
    h = bn(lrelu(conv(h, params['w2'], params['b2'], 2, 1)), params['bn2'])
    h = bn(lrelu(conv(h, params['w3'], params['b3'], 2, 1)), params['bn3'])
    h = jnp.transpose(h, (0, 2, 1))
    return h @ params['wl'].T + params['bl']


if __name__ == "__main__":
    key = jax.random.PRNGKey(0)
    kx, kp = jax.random.split(key)
    B, T, L = 2, 4, 256
    # torch-style input: (B, n_traces, 1, L); trace_id selects the (B, 1, L) trace.
    x = jax.random.normal(kx, (B, T, 1, L), jnp.float32)
    params = init_params(kp)
    prep = prepare_params(params, L)          # one-time host-side folding (hoisted)

    fwd = jax.jit(cnn_patch_encoder, static_argnums=(2,))
    out = jax.block_until_ready(fwd(x, prep, 0))

    assert out.shape == (B, 16, 128), out.shape
    ref = reference(x, params, trace_id=0)
    np.testing.assert_allclose(np.asarray(out), np.asarray(ref), rtol=2e-4, atol=2e-4)
    print("KERNEL_OK")
</pallas_src>

<mosaic_0001>
module attributes {stable_mosaic.version = 11 : i64} {
  func.func @_encoder_kernel(%arg0: i32, %arg1: memref<1x260x1xf32, #tpu.memory_space<vmem>>, %arg2: memref<8x1x8xf32, #tpu.memory_space<vmem>>, %arg3: memref<1x8xf32, #tpu.memory_space<vmem>>, %arg4: memref<4x8x64xf32, #tpu.memory_space<vmem>>, %arg5: memref<32x64xf32, #tpu.memory_space<vmem>>, %arg6: memref<4x64x128xf32, #tpu.memory_space<vmem>>, %arg7: memref<16x128xf32, #tpu.memory_space<vmem>>, %arg8: memref<128x128xf32, #tpu.memory_space<vmem>>, %arg9: memref<1x128xf32, #tpu.memory_space<vmem>>, %arg10: memref<1x16x128xf32, #tpu.memory_space<vmem>>, %arg11: memref<66x8xf32, #tpu.memory_space<vmem>>, %arg12: memref<34x64xf32, #tpu.memory_space<vmem>>) attributes {dimension_semantics = [#tpu.dimension_semantics<parallel>], iteration_bounds = array<i64: 2>, scalar_prefetch = 0 : i64, scratch_operands = 2 : i64, tpu.core_type = #tpu.core_type<tc>, window_params = [{transform_indices = @transform_0, window_bounds = array<i64: 1, 260, 1>}, {pipeline_mode = #tpu.pipeline_mode<synchronous>, transform_indices = @transform_1, window_bounds = array<i64: 8, 1, 8>}, {pipeline_mode = #tpu.pipeline_mode<synchronous>, transform_indices = @transform_2, window_bounds = array<i64: 1, 8>}, {pipeline_mode = #tpu.pipeline_mode<synchronous>, transform_indices = @transform_3, window_bounds = array<i64: 4, 8, 64>}, {pipeline_mode = #tpu.pipeline_mode<synchronous>, transform_indices = @transform_4, window_bounds = array<i64: 32, 64>}, {pipeline_mode = #tpu.pipeline_mode<synchronous>, transform_indices = @transform_5, window_bounds = array<i64: 4, 64, 128>}, {pipeline_mode = #tpu.pipeline_mode<synchronous>, transform_indices = @transform_6, window_bounds = array<i64: 16, 128>}, {pipeline_mode = #tpu.pipeline_mode<synchronous>, transform_indices = @transform_7, window_bounds = array<i64: 128, 128>}, {pipeline_mode = #tpu.pipeline_mode<synchronous>, transform_indices = @transform_8, window_bounds = array<i64: 1, 128>}, {transform_indices = @transform_9, window_bounds = array<i64: 1, 16, 128>}]} {
    %cst = arith.constant 0.000000e+00 : f32
    %0 = vector.broadcast %cst : f32 to vector<64x8xf32>
    %c0 = arith.constant 0 : index
    %c0_0 = arith.constant 0 : index
    %c0_1 = arith.constant 0 : index
    %1 = tpu.strided_load %arg1[%c0, %c0_0, %c0_1] {strides = array<i32: 1, 4, 1>} : memref<1x260x1xf32, #tpu.memory_space<vmem>>, vector<1x64x1xf32>
    %2 = vector.shape_cast %1 : vector<1x64x1xf32> to vector<64x1xf32>
    %c0_2 = arith.constant 0 : index
    %c0_3 = arith.constant 0 : index
    %c0_4 = arith.constant 0 : index
    %3 = vector.load %arg2[%c0_2, %c0_3, %c0_4] : memref<8x1x8xf32, #tpu.memory_space<vmem>>, vector<1x1x8xf32>
    %4 = vector.shape_cast %3 : vector<1x1x8xf32> to vector<1x8xf32>
    %5 = vector.broadcast %2 : vector<64x1xf32> to vector<64x8xf32>
    %6 = vector.broadcast %4 : vector<1x8xf32> to vector<64x8xf32>
    %7 = arith.mulf %5, %6 : vector<64x8xf32>
    %8 = arith.addf %0, %7 : vector<64x8xf32>
    %c0_5 = arith.constant 0 : index
    %c1 = arith.constant 1 : index
    %c0_6 = arith.constant 0 : index
    %9 = tpu.strided_load %arg1[%c0_5, %c1, %c0_6] {strides = array<i32: 1, 4, 1>} : memref<1x260x1xf32, #tpu.memory_space<vmem>>, vector<1x64x1xf32>
    %10 = vector.shape_cast %9 : vector<1x64x1xf32> to vector<64x1xf32>
    %c1_7 = arith.constant 1 : index
    %c0_8 = arith.constant 0 : index
    %c0_9 = arith.constant 0 : index
    %11 = vector.load %arg2[%c1_7, %c0_8, %c0_9] : memref<8x1x8xf32, #tpu.memory_space<vmem>>, vector<1x1x8xf32>
    %12 = vector.shape_cast %11 : vector<1x1x8xf32> to vector<1x8xf32>
    %13 = vector.broadcast %10 : vector<64x1xf32> to vector<64x8xf32>
    %14 = vector.broadcast %12 : vector<1x8xf32> to vector<64x8xf32>
    %15 = arith.mulf %13, %14 : vector<64x8xf32>
    %16 = arith.addf %8, %15 : vector<64x8xf32>
    %c0_10 = arith.constant 0 : index
    %c2 = arith.constant 2 : index
    %c0_11 = arith.constant 0 : index
    %17 = tpu.strided_load %arg1[%c0_10, %c2, %c0_11] {strides = array<i32: 1, 4, 1>} : memref<1x260x1xf32, #tpu.memory_space<vmem>>, vector<1x64x1xf32>
    %18 = vector.shape_cast %17 : vector<1x64x1xf32> to vector<64x1xf32>
    %c2_12 = arith.constant 2 : index
    %c0_13 = arith.constant 0 : index
    %c0_14 = arith.constant 0 : index
    %19 = vector.load %arg2[%c2_12, %c0_13, %c0_14] : memref<8x1x8xf32, #tpu.memory_space<vmem>>, vector<1x1x8xf32>
    %20 = vector.shape_cast %19 : vector<1x1x8xf32> to vector<1x8xf32>
    %21 = vector.broadcast %18 : vector<64x1xf32> to vector<64x8xf32>
    %22 = vector.broadcast %20 : vector<1x8xf32> to vector<64x8xf32>
    %23 = arith.mulf %21, %22 : vector<64x8xf32>
    %24 = arith.addf %16, %23 : vector<64x8xf32>
    %c0_15 = arith.constant 0 : index
    %c3 = arith.constant 3 : index
    %c0_16 = arith.constant 0 : index
    %25 = tpu.strided_load %arg1[%c0_15, %c3, %c0_16] {strides = array<i32: 1, 4, 1>} : memref<1x260x1xf32, #tpu.memory_space<vmem>>, vector<1x64x1xf32>
    %26 = vector.shape_cast %25 : vector<1x64x1xf32> to vector<64x1xf32>
    %c3_17 = arith.constant 3 : index
    %c0_18 = arith.constant 0 : index
    %c0_19 = arith.constant 0 : index
    %27 = vector.load %arg2[%c3_17, %c0_18, %c0_19] : memref<8x1x8xf32, #tpu.memory_space<vmem>>, vector<1x1x8xf32>
    %28 = vector.shape_cast %27 : vector<1x1x8xf32> to vector<1x8xf32>
    %29 = vector.broadcast %26 : vector<64x1xf32> to vector<64x8xf32>
    %30 = vector.broadcast %28 : vector<1x8xf32> to vector<64x8xf32>
    %31 = arith.mulf %29, %30 : vector<64x8xf32>
    %32 = arith.addf %24, %31 : vector<64x8xf32>
    %c0_20 = arith.constant 0 : index
    %c4 = arith.constant 4 : index
    %c0_21 = arith.constant 0 : index
    %33 = tpu.strided_load %arg1[%c0_20, %c4, %c0_21] {strides = array<i32: 1, 4, 1>} : memref<1x260x1xf32, #tpu.memory_space<vmem>>, vector<1x64x1xf32>
    %34 = vector.shape_cast %33 : vector<1x64x1xf32> to vector<64x1xf32>
    %c4_22 = arith.constant 4 : index
    %c0_23 = arith.constant 0 : index
    %c0_24 = arith.constant 0 : index
    %35 = vector.load %arg2[%c4_22, %c0_23, %c0_24] : memref<8x1x8xf32, #tpu.memory_space<vmem>>, vector<1x1x8xf32>
    %36 = vector.shape_cast %35 : vector<1x1x8xf32> to vector<1x8xf32>
    %37 = vector.broadcast %34 : vector<64x1xf32> to vector<64x8xf32>
    %38 = vector.broadcast %36 : vector<1x8xf32> to vector<64x8xf32>
    %39 = arith.mulf %37, %38 : vector<64x8xf32>
    %40 = arith.addf %32, %39 : vector<64x8xf32>
    %c0_25 = arith.constant 0 : index
    %c5 = arith.constant 5 : index
    %c0_26 = arith.constant 0 : index
    %41 = tpu.strided_load %arg1[%c0_25, %c5, %c0_26] {strides = array<i32: 1, 4, 1>} : memref<1x260x1xf32, #tpu.memory_space<vmem>>, vector<1x64x1xf32>
    %42 = vector.shape_cast %41 : vector<1x64x1xf32> to vector<64x1xf32>
    %c5_27 = arith.constant 5 : index
    %c0_28 = arith.constant 0 : index
    %c0_29 = arith.constant 0 : index
    %43 = vector.load %arg2[%c5_27, %c0_28, %c0_29] : memref<8x1x8xf32, #tpu.memory_space<vmem>>, vector<1x1x8xf32>
    %44 = vector.shape_cast %43 : vector<1x1x8xf32> to vector<1x8xf32>
    %45 = vector.broadcast %42 : vector<64x1xf32> to vector<64x8xf32>
    %46 = vector.broadcast %44 : vector<1x8xf32> to vector<64x8xf32>
    %47 = arith.mulf %45, %46 : vector<64x8xf32>
    %48 = arith.addf %40, %47 : vector<64x8xf32>
    %c0_30 = arith.constant 0 : index
    %c6 = arith.constant 6 : index
    %c0_31 = arith.constant 0 : index
    %49 = tpu.strided_load %arg1[%c0_30, %c6, %c0_31] {strides = array<i32: 1, 4, 1>} : memref<1x260x1xf32, #tpu.memory_space<vmem>>, vector<1x64x1xf32>
    %50 = vector.shape_cast %49 : vector<1x64x1xf32> to vector<64x1xf32>
    %c6_32 = arith.constant 6 : index
    %c0_33 = arith.constant 0 : index
    %c0_34 = arith.constant 0 : index
    %51 = vector.load %arg2[%c6_32, %c0_33, %c0_34] : memref<8x1x8xf32, #tpu.memory_space<vmem>>, vector<1x1x8xf32>
    %52 = vector.shape_cast %51 : vector<1x1x8xf32> to vector<1x8xf32>
    %53 = vector.broadcast %50 : vector<64x1xf32> to vector<64x8xf32>
    %54 = vector.broadcast %52 : vector<1x8xf32> to vector<64x8xf32>
    %55 = arith.mulf %53, %54 : vector<64x8xf32>
    %56 = arith.addf %48, %55 : vector<64x8xf32>
    %c0_35 = arith.constant 0 : index
    %c7 = arith.constant 7 : index
    %c0_36 = arith.constant 0 : index
    %57 = tpu.strided_load %arg1[%c0_35, %c7, %c0_36] {strides = array<i32: 1, 4, 1>} : memref<1x260x1xf32, #tpu.memory_space<vmem>>, vector<1x64x1xf32>
    %58 = vector.shape_cast %57 : vector<1x64x1xf32> to vector<64x1xf32>
    %c7_37 = arith.constant 7 : index
    %c0_38 = arith.constant 0 : index
    %c0_39 = arith.constant 0 : index
    %59 = vector.load %arg2[%c7_37, %c0_38, %c0_39] : memref<8x1x8xf32, #tpu.memory_space<vmem>>, vector<1x1x8xf32>
    %60 = vector.shape_cast %59 : vector<1x1x8xf32> to vector<1x8xf32>
    %61 = vector.broadcast %58 : vector<64x1xf32> to vector<64x8xf32>
    %62 = vector.broadcast %60 : vector<1x8xf32> to vector<64x8xf32>
    %63 = arith.mulf %61, %62 : vector<64x8xf32>
    %64 = arith.addf %56, %63 : vector<64x8xf32>
    %c0_40 = arith.constant 0 : index
    %c0_41 = arith.constant 0 : index
    %65 = vector.load %arg3[%c0_40, %c0_41] : memref<1x8xf32, #tpu.memory_space<vmem>>, vector<1x8xf32>
    %66 = vector.broadcast %65 : vector<1x8xf32> to vector<64x8xf32>
    %67 = arith.addf %64, %66 : vector<64x8xf32>
    %cst_42 = arith.constant 0.000000e+00 : f32
    %68 = vector.broadcast %cst_42 : f32 to vector<64x8xf32>
    %69 = arith.cmpf ogt, %67, %68 : vector<64x8xf32>
    %cst_43 = arith.constant 0.00999999977 : f32
    %70 = vector.broadcast %cst_43 : f32 to vector<64x8xf32>
    %71 = arith.mulf %70, %67 : vector<64x8xf32>
    %72 = arith.select %69, %67, %71 : vector<64x8xi1>, vector<64x8xf32>
    %cst_44 = arith.constant 0.000000e+00 : f32
    %73 = vector.broadcast %cst_44 : f32 to vector<1x8xf32>
    %c0_45 = arith.constant 0 : index
    %c0_46 = arith.constant 0 : index
    %74 = vector.load %arg11[%c0_45, %c0_46] : memref<66x8xf32, #tpu.memory_space<vmem>>, vector<1x8xf32>
    tpu.vector_store %arg11[%c0_45, %c0_46], %73 {strides = array<i32>} : memref<66x8xf32, #tpu.memory_space<vmem>>, vector<1x8xf32>,
    %cst_47 = arith.constant 0.000000e+00 : f32
    %75 = vector.broadcast %cst_47 : f32 to vector<1x8xf32>
    %c65 = arith.constant 65 : index
    %c0_48 = arith.constant 0 : index
    %76 = vector.load %arg11[%c65, %c0_48] : memref<66x8xf32, #tpu.memory_space<vmem>>, vector<1x8xf32>
    tpu.vector_store %arg11[%c65, %c0_48], %75 {strides = array<i32>} : memref<66x8xf32, #tpu.memory_space<vmem>>, vector<1x8xf32>,
    %c1_49 = arith.constant 1 : index
    %c0_50 = arith.constant 0 : index
    %77 = vector.load %arg11[%c1_49, %c0_50] : memref<66x8xf32, #tpu.memory_space<vmem>>, vector<64x8xf32>
    tpu.vector_store %arg11[%c1_49, %c0_50], %72 {strides = array<i32>} : memref<66x8xf32, #tpu.memory_space<vmem>>, vector<64x8xf32>,
    %cst_51 = arith.constant 0.000000e+00 : f32
    %78 = vector.broadcast %cst_51 : f32 to vector<32x64xf32>
    %c0_52 = arith.constant 0 : index
    %c0_53 = arith.constant 0 : index
    %79 = tpu.strided_load %arg11[%c0_52, %c0_53] {strides = array<i32: 2, 1>} : memref<66x8xf32, #tpu.memory_space<vmem>>, vector<32x8xf32>
    %c0_54 = arith.constant 0 : index
    %c0_55 = arith.constant 0 : index
    %c0_56 = arith.constant 0 : index
    %80 = vector.load %arg4[%c0_54, %c0_55, %c0_56] : memref<4x8x64xf32, #tpu.memory_space<vmem>>, vector<1x8x64xf32>
    %81 = vector.shape_cast %80 : vector<1x8x64xf32> to vector<8x64xf32>
    %cst_57 = arith.constant dense<0.000000e+00> : vector<32x64xf32>
    %82 = tpu.matmul %79, %81, %cst_57 {dimension_numbers = #tpu.dot_dimension_numbers<[1], [0], [0], [1], [0, 0, 1, 1], [], []>} : vector<32x8xf32>, vector<8x64xf32>, vector<32x64xf32> -> vector<32x64xf32>
    %83 = arith.addf %78, %82 : vector<32x64xf32>
    %c1_58 = arith.constant 1 : index
    %c0_59 = arith.constant 0 : index
    %84 = tpu.strided_load %arg11[%c1_58, %c0_59] {strides = array<i32: 2, 1>} : memref<66x8xf32, #tpu.memory_space<vmem>>, vector<32x8xf32>
    %c1_60 = arith.constant 1 : index
    %c0_61 = arith.constant 0 : index
    %c0_62 = arith.constant 0 : index
    %85 = vector.load %arg4[%c1_60, %c0_61, %c0_62] : memref<4x8x64xf32, #tpu.memory_space<vmem>>, vector<1x8x64xf32>
    %86 = vector.shape_cast %85 : vector<1x8x64xf32> to vector<8x64xf32>
    %cst_63 = arith.constant dense<0.000000e+00> : vector<32x64xf32>
    %87 = tpu.matmul %84, %86, %cst_63 {dimension_numbers = #tpu.dot_dimension_numbers<[1], [0], [0], [1], [0, 0, 1, 1], [], []>} : vector<32x8xf32>, vector<8x64xf32>, vector<32x64xf32> -> vector<32x64xf32>
    %88 = arith.addf %83, %87 : vector<32x64xf32>
    %c2_64 = arith.constant 2 : index
    %c0_65 = arith.constant 0 : index
    %89 = tpu.strided_load %arg11[%c2_64, %c0_65] {strides = array<i32: 2, 1>} : memref<66x8xf32, #tpu.memory_space<vmem>>, vector<32x8xf32>
    %c2_66 = arith.constant 2 : index
    %c0_67 = arith.constant 0 : index
    %c0_68 = arith.constant 0 : index
    %90 = vector.load %arg4[%c2_66, %c0_67, %c0_68] : memref<4x8x64xf32, #tpu.memory_space<vmem>>, vector<1x8x64xf32>
    %91 = vector.shape_cast %90 : vector<1x8x64xf32> to vector<8x64xf32>
    %cst_69 = arith.constant dense<0.000000e+00> : vector<32x64xf32>
    %92 = tpu.matmul %89, %91, %cst_69 {dimension_numbers = #tpu.dot_dimension_numbers<[1], [0], [0], [1], [0, 0, 1, 1], [], []>} : vector<32x8xf32>, vector<8x64xf32>, vector<32x64xf32> -> vector<32x64xf32>
    %93 = arith.addf %88, %92 : vector<32x64xf32>
    %c3_70 = arith.constant 3 : index
    %c0_71 = arith.constant 0 : index
    %94 = tpu.strided_load %arg11[%c3_70, %c0_71] {strides = array<i32: 2, 1>} : memref<66x8xf32, #tpu.memory_space<vmem>>, vector<32x8xf32>
    %c3_72 = arith.constant 3 : index
    %c0_73 = arith.constant 0 : index
    %c0_74 = arith.constant 0 : index
    %95 = vector.load %arg4[%c3_72, %c0_73, %c0_74] : memref<4x8x64xf32, #tpu.memory_space<vmem>>, vector<1x8x64xf32>
    %96 = vector.shape_cast %95 : vector<1x8x64xf32> to vector<8x64xf32>
    %cst_75 = arith.constant dense<0.000000e+00> : vector<32x64xf32>
    %97 = tpu.matmul %94, %96, %cst_75 {dimension_numbers = #tpu.dot_dimension_numbers<[1], [0], [0], [1], [0, 0, 1, 1], [], []>} : vector<32x8xf32>, vector<8x64xf32>, vector<32x64xf32> -> vector<32x64xf32>
    %98 = arith.addf %93, %97 : vector<32x64xf32>
    %c0_76 = arith.constant 0 : index
    %c0_77 = arith.constant 0 : index
    %99 = vector.load %arg5[%c0_76, %c0_77] : memref<32x64xf32, #tpu.memory_space<vmem>>, vector<32x64xf32>
    %100 = arith.addf %98, %99 : vector<32x64xf32>
    %cst_78 = arith.constant 0.000000e+00 : f32
    %101 = vector.broadcast %cst_78 : f32 to vector<32x64xf32>
    %102 = arith.cmpf ogt, %100, %101 : vector<32x64xf32>
    %cst_79 = arith.constant 0.00999999977 : f32
    %103 = vector.broadcast %cst_79 : f32 to vector<32x64xf32>
    %104 = arith.mulf %103, %100 : vector<32x64xf32>
    %105 = arith.select %102, %100, %104 : vector<32x64xi1>, vector<32x64xf32>
    %cst_80 = arith.constant 0.000000e+00 : f32
    %106 = vector.broadcast %cst_80 : f32 to vector<1x64xf32>
    %c0_81 = arith.constant 0 : index
    %c0_82 = arith.constant 0 : index
    %107 = vector.load %arg12[%c0_81, %c0_82] : memref<34x64xf32, #tpu.memory_space<vmem>>, vector<1x64xf32>
    tpu.vector_store %arg12[%c0_81, %c0_82], %106 {strides = array<i32>} : memref<34x64xf32, #tpu.memory_space<vmem>>, vector<1x64xf32>,
    %cst_83 = arith.constant 0.000000e+00 : f32
    %108 = vector.broadcast %cst_83 : f32 to vector<1x64xf32>
    %c33 = arith.constant 33 : index
    %c0_84 = arith.constant 0 : index
    %109 = vector.load %arg12[%c33, %c0_84] : memref<34x64xf32, #tpu.memory_space<vmem>>, vector<1x64xf32>
    tpu.vector_store %arg12[%c33, %c0_84], %108 {strides = array<i32>} : memref<34x64xf32, #tpu.memory_space<vmem>>, vector<1x64xf32>,
    %c1_85 = arith.constant 1 : index
    %c0_86 = arith.constant 0 : index
    %110 = vector.load %arg12[%c1_85, %c0_86] : memref<34x64xf32, #tpu.memory_space<vmem>>, vector<32x64xf32>
    tpu.vector_store %arg12[%c1_85, %c0_86], %105 {strides = array<i32>} : memref<34x64xf32, #tpu.memory_space<vmem>>, vector<32x64xf32>,
    %cst_87 = arith.constant 0.000000e+00 : f32
    %111 = vector.broadcast %cst_87 : f32 to vector<16x128xf32>
    %c0_88 = arith.constant 0 : index
    %c0_89 = arith.constant 0 : index
    %112 = tpu.strided_load %arg12[%c0_88, %c0_89] {strides = array<i32: 2, 1>} : memref<34x64xf32, #tpu.memory_space<vmem>>, vector<16x64xf32>
    %c0_90 = arith.constant 0 : index
    %c0_91 = arith.constant 0 : index
    %c0_92 = arith.constant 0 : index
    %113 = vector.load %arg6[%c0_90, %c0_91, %c0_92] : memref<4x64x128xf32, #tpu.memory_space<vmem>>, vector<1x64x128xf32>
    %114 = vector.shape_cast %113 : vector<1x64x128xf32> to vector<64x128xf32>
    %cst_93 = arith.constant dense<0.000000e+00> : vector<16x128xf32>
    %115 = tpu.matmul %112, %114, %cst_93 {dimension_numbers = #tpu.dot_dimension_numbers<[1], [0], [0], [1], [0, 0, 1, 1], [], []>} : vector<16x64xf32>, vector<64x128xf32>, vector<16x128xf32> -> vector<16x128xf32>
    %116 = arith.addf %111, %115 : vector<16x128xf32>
    %c1_94 = arith.constant 1 : index
    %c0_95 = arith.constant 0 : index
    %117 = tpu.strided_load %arg12[%c1_94, %c0_95] {strides = array<i32: 2, 1>} : memref<34x64xf32, #tpu.memory_space<vmem>>, vector<16x64xf32>
    %c1_96 = arith.constant 1 : index
    %c0_97 = arith.constant 0 : index
    %c0_98 = arith.constant 0 : index
    %118 = vector.load %arg6[%c1_96, %c0_97, %c0_98] : memref<4x64x128xf32, #tpu.memory_space<vmem>>, vector<1x64x128xf32>
    %119 = vector.shape_cast %118 : vector<1x64x128xf32> to vector<64x128xf32>
    %cst_99 = arith.constant dense<0.000000e+00> : vector<16x128xf32>
    %120 = tpu.matmul %117, %119, %cst_99 {dimension_numbers = #tpu.dot_dimension_numbers<[1], [0], [0], [1], [0, 0, 1, 1], [], []>} : vector<16x64xf32>, vector<64x128xf32>, vector<16x128xf32> -> vector<16x128xf32>
    %121 = arith.addf %116, %120 : vector<16x128xf32>
    %c2_100 = arith.constant 2 : index
    %c0_101 = arith.constant 0 : index
    %122 = tpu.strided_load %arg12[%c2_100, %c0_101] {strides = array<i32: 2, 1>} : memref<34x64xf32, #tpu.memory_space<vmem>>, vector<16x64xf32>
    %c2_102 = arith.constant 2 : index
    %c0_103 = arith.constant 0 : index
    %c0_104 = arith.constant 0 : index
    %123 = vector.load %arg6[%c2_102, %c0_103, %c0_104] : memref<4x64x128xf32, #tpu.memory_space<vmem>>, vector<1x64x128xf32>
    %124 = vector.shape_cast %123 : vector<1x64x128xf32> to vector<64x128xf32>
    %cst_105 = arith.constant dense<0.000000e+00> : vector<16x128xf32>
    %125 = tpu.matmul %122, %124, %cst_105 {dimension_numbers = #tpu.dot_dimension_numbers<[1], [0], [0], [1], [0, 0, 1, 1], [], []>} : vector<16x64xf32>, vector<64x128xf32>, vector<16x128xf32> -> vector<16x128xf32>
    %126 = arith.addf %121, %125 : vector<16x128xf32>
    %c3_106 = arith.constant 3 : index
    %c0_107 = arith.constant 0 : index
    %127 = tpu.strided_load %arg12[%c3_106, %c0_107] {strides = array<i32: 2, 1>} : memref<34x64xf32, #tpu.memory_space<vmem>>, vector<16x64xf32>
    %c3_108 = arith.constant 3 : index
    %c0_109 = arith.constant 0 : index
    %c0_110 = arith.constant 0 : index
    %128 = vector.load %arg6[%c3_108, %c0_109, %c0_110] : memref<4x64x128xf32, #tpu.memory_space<vmem>>, vector<1x64x128xf32>
    %129 = vector.shape_cast %128 : vector<1x64x128xf32> to vector<64x128xf32>
    %cst_111 = arith.constant dense<0.000000e+00> : vector<16x128xf32>
    %130 = tpu.matmul %127, %129, %cst_111 {dimension_numbers = #tpu.dot_dimension_numbers<[1], [0], [0], [1], [0, 0, 1, 1], [], []>} : vector<16x64xf32>, vector<64x128xf32>, vector<16x128xf32> -> vector<16x128xf32>
    %131 = arith.addf %126, %130 : vector<16x128xf32>
    %c0_112 = arith.constant 0 : index
    %c0_113 = arith.constant 0 : index
    %132 = vector.load %arg7[%c0_112, %c0_113] : memref<16x128xf32, #tpu.memory_space<vmem>>, vector<16x128xf32>
    %133 = arith.addf %131, %132 : vector<16x128xf32>
    %cst_114 = arith.constant 0.000000e+00 : f32
    %134 = vector.broadcast %cst_114 : f32 to vector<16x128xf32>
    %135 = arith.cmpf ogt, %133, %134 : vector<16x128xf32>
    %cst_115 = arith.constant 0.00999999977 : f32
    %136 = vector.broadcast %cst_115 : f32 to vector<16x128xf32>
    %137 = arith.mulf %136, %133 : vector<16x128xf32>
    %138 = arith.select %135, %133, %137 : vector<16x128xi1>, vector<16x128xf32>
    %c0_116 = arith.constant 0 : index
    %c0_117 = arith.constant 0 : index
    %139 = vector.load %arg8[%c0_116, %c0_117] : memref<128x128xf32, #tpu.memory_space<vmem>>, vector<128x128xf32>
    %cst_118 = arith.constant dense<0.000000e+00> : vector<16x128xf32>
    %140 = tpu.matmul %138, %139, %cst_118 {dimension_numbers = #tpu.dot_dimension_numbers<[1], [0], [0], [1], [0, 0, 1, 1], [], []>} : vector<16x128xf32>, vector<128x128xf32>, vector<16x128xf32> -> vector<16x128xf32>
    %c0_119 = arith.constant 0 : index
    %c0_120 = arith.constant 0 : index
    %141 = vector.load %arg9[%c0_119, %c0_120] : memref<1x128xf32, #tpu.memory_space<vmem>>, vector<1x128xf32>
    %142 = vector.broadcast %141 : vector<1x128xf32> to vector<16x128xf32>
    %143 = arith.addf %140, %142 : vector<16x128xf32>
    %c0_121 = arith.constant 0 : index
    %c0_122 = arith.constant 0 : index
    %c0_123 = arith.constant 0 : index
    %144 = vector.load %arg10[%c0_121, %c0_122, %c0_123] : memref<1x16x128xf32, #tpu.memory_space<vmem>>, vector<1x16x128xf32>
    %145 = vector.shape_cast %144 : vector<1x16x128xf32> to vector<16x128xf32>
    %146 = vector.shape_cast %143 : vector<16x128xf32> to vector<1x16x128xf32>
    tpu.vector_store %arg10[%c0_121, %c0_122, %c0_123], %146 {strides = array<i32>} : memref<1x16x128xf32, #tpu.memory_space<vmem>>, vector<1x16x128xf32>,
    return
  }
  func.func @transform_0(%arg0: i32) -> (i32, i32, i32) {
    %c0_i32 = arith.constant 0 : i32
    %c0_i32_0 = arith.constant 0 : i32
    %c0_i32_1 = arith.constant 0 : i32
    return %arg0, %c0_i32, %c0_i32_0 : i32, i32, i32
  }
  func.func @transform_1(%arg0: i32) -> (i32, i32, i32) {
    %c0_i32 = arith.constant 0 : i32
    %c0_i32_0 = arith.constant 0 : i32
    %c0_i32_1 = arith.constant 0 : i32
    %c0_i32_2 = arith.constant 0 : i32
    return %c0_i32, %c0_i32_0, %c0_i32_1 : i32, i32, i32
  }
  func.func @transform_2(%arg0: i32) -> (i32, i32) {
    %c0_i32 = arith.constant 0 : i32
    %c0_i32_0 = arith.constant 0 : i32
    %c0_i32_1 = arith.constant 0 : i32
    return %c0_i32, %c0_i32_0 : i32, i32
  }
  func.func @transform_3(%arg0: i32) -> (i32, i32, i32) {
    %c0_i32 = arith.constant 0 : i32
    %c0_i32_0 = arith.constant 0 : i32
    %c0_i32_1 = arith.constant 0 : i32
    %c0_i32_2 = arith.constant 0 : i32
    return %c0_i32, %c0_i32_0, %c0_i32_1 : i32, i32, i32
  }
  func.func @transform_4(%arg0: i32) -> (i32, i32) {
    %c0_i32 = arith.constant 0 : i32
    %c0_i32_0 = arith.constant 0 : i32
    %c0_i32_1 = arith.constant 0 : i32
    return %c0_i32, %c0_i32_0 : i32, i32
  }
  func.func @transform_5(%arg0: i32) -> (i32, i32, i32) {
    %c0_i32 = arith.constant 0 : i32
    %c0_i32_0 = arith.constant 0 : i32
    %c0_i32_1 = arith.constant 0 : i32
    %c0_i32_2 = arith.constant 0 : i32
    return %c0_i32, %c0_i32_0, %c0_i32_1 : i32, i32, i32
  }
  func.func @transform_6(%arg0: i32) -> (i32, i32) {
    %c0_i32 = arith.constant 0 : i32
    %c0_i32_0 = arith.constant 0 : i32
    %c0_i32_1 = arith.constant 0 : i32
    return %c0_i32, %c0_i32_0 : i32, i32
  }
  func.func @transform_7(%arg0: i32) -> (i32, i32) {
    %c0_i32 = arith.constant 0 : i32
    %c0_i32_0 = arith.constant 0 : i32
    %c0_i32_1 = arith.constant 0 : i32
    return %c0_i32, %c0_i32_0 : i32, i32
  }
  func.func @transform_8(%arg0: i32) -> (i32, i32) {
    %c0_i32 = arith.constant 0 : i32
    %c0_i32_0 = arith.constant 0 : i32
    %c0_i32_1 = arith.constant 0 : i32
    return %c0_i32, %c0_i32_0 : i32, i32
  }
  func.func @transform_9(%arg0: i32) -> (i32, i32, i32) {
    %c0_i32 = arith.constant 0 : i32
    %c0_i32_0 = arith.constant 0 : i32
    %c0_i32_1 = arith.constant 0 : i32
    return %arg0, %c0_i32, %c0_i32_0 : i32, i32, i32
  }
}

</mosaic_0001>

<bundles_post_ra>
// kernel: squeeze.0
= control target key start
LH: loop header
LB: loop body
LE: loop exit
PB: predicated region body
PF: predicated region fallthrough
CT: control target
= control target key end

     0   :  { %s852_s0 = inlined_call_operand.vmem [shape: f32[2,256], index: 0, kind: input, shape index: {}]   ;;  %s853_s1 = inlined_call_operand.vmem [shape: f32[2,256,1], index: 1, kind: output, shape index: {}]  }
   0x1   :  { %v16_v0 = vld [vmem:[%s852_s0] ss:$0 sm:$0xff]  ;;  %v530_v1 = vld [vmem:[%s852_s0 + $0x1] ss:$0 sm:$0xff]  ;;  %v576_v2 = vld [vmem:[%s852_s0 + $0x3] ss:$0 sm:$0xff] }
   0x2   :  { %19 = vbcast.lane.b32.xlu1 %v16_v0, 264  ;;  %6 = vbcast.lane.b32.xlu0 %v16_v0, 256  ;;  %v574_v3 = vld [vmem:[%s852_s0 + $0x2] ss:$0 sm:$0xff] }
   0x6   :  { %27 = vbcast.lane.b32.xlu1 %v530_v1, 264  ;;  %12 = vbcast.lane.b32.xlu0 %v530_v1, 256 }
   0xa   :  { %42 = vbcast.lane.b32.xlu1 %v530_v1, 272  ;;  %34 = vbcast.lane.b32.xlu0 %v16_v0, 272 }
   0xe   :  { %57 = vbcast.lane.b32.xlu1 %v530_v1, 280  ;;  %49 = vbcast.lane.b32.xlu0 %v16_v0, 280 }
  0x12   :  { %72 = vbcast.lane.b32.xlu1 %v530_v1, 288  ;;  %64 = vbcast.lane.b32.xlu0 %v16_v0, 288 }
  0x16   :  { %87 = vbcast.lane.b32.xlu1 %v530_v1, 296  ;;  %79 = vbcast.lane.b32.xlu0 %v16_v0, 296 }
  0x1a   :  { %102 = vbcast.lane.b32.xlu1 %v530_v1, 304  ;;  %94 = vbcast.lane.b32.xlu0 %v16_v0, 304 }
  0x1e   :  { %117 = vbcast.lane.b32.xlu1 %v530_v1, 312  ;;  %109 = vbcast.lane.b32.xlu0 %v16_v0, 312 }
  0x22   :  { %132 = vbcast.lane.b32.xlu1 %v530_v1, 320  ;;  %124 = vbcast.lane.b32.xlu0 %v16_v0, 320 }
  0x26   :  { %147 = vbcast.lane.b32.xlu1 %v530_v1, 328  ;;  %139 = vbcast.lane.b32.xlu0 %v16_v0, 328 }
  0x2a   :  { %162 = vbcast.lane.b32.xlu1 %v530_v1, 336  ;;  %154 = vbcast.lane.b32.xlu0 %v16_v0, 336 }
  0x2e   :  { %177 = vbcast.lane.b32.xlu1 %v530_v1, 344  ;;  %169 = vbcast.lane.b32.xlu0 %v16_v0, 344 }
  0x32   :  { %192 = vbcast.lane.b32.xlu1 %v530_v1, 352  ;;  %184 = vbcast.lane.b32.xlu0 %v16_v0, 352 }
  0x36   :  { %207 = vbcast.lane.b32.xlu1 %v530_v1, 360  ;;  %199 = vbcast.lane.b32.xlu0 %v16_v0, 360 }
  0x3a   :  { %222 = vbcast.lane.b32.xlu1 %v530_v1, 368  ;;  %214 = vbcast.lane.b32.xlu0 %v16_v0, 368 }
  0x3e   :  { %237 = vbcast.lane.b32.xlu1 %v530_v1, 376  ;;  %229 = vbcast.lane.b32.xlu0 %v16_v0, 376 }
  0x42   :  { %252 = vbcast.lane.b32.xlu1 %v576_v2, 256  ;;  %244 = vbcast.lane.b32.xlu0 %v574_v3, 256 }
  0x46   :  { %269 = vbcast.lane.b32.xlu1 %v576_v2, 264  ;;  %260 = vbcast.lane.b32.xlu0 %v574_v3, 264 }
  0x4a   :  { %286 = vbcast.lane.b32.xlu1 %v576_v2, 272  ;;  %277 = vbcast.lane.b32.xlu0 %v574_v3, 272 }
  0x4e   :  { %303 = vbcast.lane.b32.xlu1 %v576_v2, 280  ;;  %294 = vbcast.lane.b32.xlu0 %v574_v3, 280 }
  0x52   :  { %320 = vbcast.lane.b32.xlu1 %v576_v2, 288  ;;  %311 = vbcast.lane.b32.xlu0 %v574_v3, 288 }
  0x56   :  { %337 = vbcast.lane.b32.xlu1 %v576_v2, 296  ;;  %328 = vbcast.lane.b32.xlu0 %v574_v3, 296 }
  0x5a   :  { %354 = vbcast.lane.b32.xlu1 %v576_v2, 304  ;;  %345 = vbcast.lane.b32.xlu0 %v574_v3, 304 }
  0x5e   :  { %371 = vbcast.lane.b32.xlu1 %v576_v2, 312  ;;  %362 = vbcast.lane.b32.xlu0 %v574_v3, 312 }
  0x62   :  { %388 = vbcast.lane.b32.xlu1 %v576_v2, 320  ;;  %379 = vbcast.lane.b32.xlu0 %v574_v3, 320 }
  0x66   :  { %405 = vbcast.lane.b32.xlu1 %v576_v2, 328  ;;  %396 = vbcast.lane.b32.xlu0 %v574_v3, 328 }
  0x6a   :  { %422 = vbcast.lane.b32.xlu1 %v576_v2, 336  ;;  %413 = vbcast.lane.b32.xlu0 %v574_v3, 336 }
  0x6e   :  { %439 = vbcast.lane.b32.xlu1 %v576_v2, 344  ;;  %430 = vbcast.lane.b32.xlu0 %v574_v3, 344 }
  0x72   :  { %456 = vbcast.lane.b32.xlu1 %v576_v2, 352  ;;  %447 = vbcast.lane.b32.xlu0 %v574_v3, 352 }
  0x74   :  { %v20_v4 = vpop.permute.xlu1 %19  ;;  %v7_v5 = vpop.permute.xlu0 %6 }
  0x75   :  { %529 = vst [vmem:[%s853_s1 + $0x8] sm:$0xff] %v20_v4  ;;  %8 = vst [vmem:[%s853_s1] sm:$0xff] %v7_v5 }
  0x76   :  { %473 = vbcast.lane.b32.xlu1 %v576_v2, 360  ;;  %464 = vbcast.lane.b32.xlu0 %v574_v3, 360 }
  0x78   :  { %v28_v6 = vpop.permute.xlu1 %27  ;;  %v13_v7 = vpop.permute.xlu0 %12 }
  0x79   :  { %531 = vst [vmem:[%s853_s1 + $0x108] sm:$0xff] %v28_v6  ;;  %528 = vst [vmem:[%s853_s1 + $0x100] sm:$0xff] %v13_v7 }
  0x7a   :  { %490 = vbcast.lane.b32.xlu1 %v576_v2, 368  ;;  %481 = vbcast.lane.b32.xlu0 %v574_v3, 368 }
  0x7c   :  { %v43_v8 = vpop.permute.xlu1 %42  ;;  %v35_v9 = vpop.permute.xlu0 %34 }
  0x7d   :  { %534 = vst [vmem:[%s853_s1 + $0x110] sm:$0xff] %v43_v8  ;;  %532 = vst [vmem:[%s853_s1 + $0x10] sm:$0xff] %v35_v9 }
  0x7e   :  { %507 = vbcast.lane.b32.xlu1 %v576_v2, 376  ;;  %498 = vbcast.lane.b32.xlu0 %v574_v3, 376 }
  0x80   :  { %v58_v10 = vpop.permute.xlu1 %57  ;;  %v50_v11 = vpop.permute.xlu0 %49 }
  0x81   :  { %537 = vst [vmem:[%s853_s1 + $0x118] sm:$0xff] %v58_v10  ;;  %535 = vst [vmem:[%s853_s1 + $0x18] sm:$0xff] %v50_v11 }
  0x84   :  { %v73_v12 = vpop.permute.xlu1 %72  ;;  %v65_v13 = vpop.permute.xlu0 %64 }
  0x85   :  { %540 = vst [vmem:[%s853_s1 + $0x120] sm:$0xff] %v73_v12  ;;  %538 = vst [vmem:[%s853_s1 + $0x20] sm:$0xff] %v65_v13 }
  0x88   :  { %v88_v14 = vpop.permute.xlu1 %87  ;;  %v80_v15 = vpop.permute.xlu0 %79 }
  0x89   :  { %543 = vst [vmem:[%s853_s1 + $0x128] sm:$0xff] %v88_v14  ;;  %541 = vst [vmem:[%s853_s1 + $0x28] sm:$0xff] %v80_v15 }
  0x8c   :  { %v103_v16 = vpop.permute.xlu1 %102  ;;  %v95_v17 = vpop.permute.xlu0 %94 }
  0x8d   :  { %546 = vst [vmem:[%s853_s1 + $0x130] sm:$0xff] %v103_v16  ;;  %544 = vst [vmem:[%s853_s1 + $0x30] sm:$0xff] %v95_v17 }
  0x90   :  { %v118_v18 = vpop.permute.xlu1 %117  ;;  %v110_v19 = vpop.permute.xlu0 %109 }
  0x91   :  { %549 = vst [vmem:[%s853_s1 + $0x138] sm:$0xff] %v118_v18  ;;  %547 = vst [vmem:[%s853_s1 + $0x38] sm:$0xff] %v110_v19 }
  0x94   :  { %v133_v20 = vpop.permute.xlu1 %132  ;;  %v125_v21 = vpop.permute.xlu0 %124 }
  0x95   :  { %552 = vst [vmem:[%s853_s1 + $0x140] sm:$0xff] %v133_v20  ;;  %550 = vst [vmem:[%s853_s1 + $0x40] sm:$0xff] %v125_v21 }
  0x98   :  { %v148_v22 = vpop.permute.xlu1 %147  ;;  %v140_v23 = vpop.permute.xlu0 %139 }
  0x99   :  { %555 = vst [vmem:[%s853_s1 + $0x148] sm:$0xff] %v148_v22  ;;  %553 = vst [vmem:[%s853_s1 + $0x48] sm:$0xff] %v140_v23 }
  0x9c   :  { %v163_v24 = vpop.permute.xlu1 %162  ;;  %v155_v25 = vpop.permute.xlu0 %154 }
  0x9d   :  { %558 = vst [vmem:[%s853_s1 + $0x150] sm:$0xff] %v163_v24  ;;  %556 = vst [vmem:[%s853_s1 + $0x50] sm:$0xff] %v155_v25 }
  0xa0   :  { %v178_v26 = vpop.permute.xlu1 %177  ;;  %v170_v27 = vpop.permute.xlu0 %169 }
  0xa1   :  { %561 = vst [vmem:[%s853_s1 + $0x158] sm:$0xff] %v178_v26  ;;  %559 = vst [vmem:[%s853_s1 + $0x58] sm:$0xff] %v170_v27 }
  0xa4   :  { %v193_v28 = vpop.permute.xlu1 %192  ;;  %v185_v29 = vpop.permute.xlu0 %184 }
  0xa5   :  { %564 = vst [vmem:[%s853_s1 + $0x160] sm:$0xff] %v193_v28  ;;  %562 = vst [vmem:[%s853_s1 + $0x60] sm:$0xff] %v185_v29 }
  0xa8   :  { %v208_v30 = vpop.permute.xlu1 %207  ;;  %v200_v31 = vpop.permute.xlu0 %199 }
  0xa9   :  { %567 = vst [vmem:[%s853_s1 + $0x168] sm:$0xff] %v208_v30  ;;  %565 = vst [vmem:[%s853_s1 + $0x68] sm:$0xff] %v200_v31 }
  0xac   :  { %v223_v32 = vpop.permute.xlu1 %222  ;;  %v215_v33 = vpop.permute.xlu0 %214 }
  0xad   :  { %570 = vst [vmem:[%s853_s1 + $0x170] sm:$0xff] %v223_v32  ;;  %568 = vst [vmem:[%s853_s1 + $0x70] sm:$0xff] %v215_v33 }
  0xb0   :  { %v238_v34 = vpop.permute.xlu1 %237  ;;  %v230_v35 = vpop.permute.xlu0 %229 }
  0xb1   :  { %573 = vst [vmem:[%s853_s1 + $0x178] sm:$0xff] %v238_v34  ;;  %571 = vst [vmem:[%s853_s1 + $0x78] sm:$0xff] %v230_v35 }
  0xb4   :  { %v253_v36 = vpop.permute.xlu1 %252  ;;  %v245_v37 = vpop.permute.xlu0 %244 }
  0xb5   :  { %577 = vst [vmem:[%s853_s1 + $0x180] sm:$0xff] %v253_v36  ;;  %575 = vst [vmem:[%s853_s1 + $0x80] sm:$0xff] %v245_v37 }
  0xb8   :  { %v270_v38 = vpop.permute.xlu1 %269  ;;  %v261_v39 = vpop.permute.xlu0 %260 }
  0xb9   :  { %581 = vst [vmem:[%s853_s1 + $0x188] sm:$0xff] %v270_v38  ;;  %579 = vst [vmem:[%s853_s1 + $0x88] sm:$0xff] %v261_v39 }
  0xbc   :  { %v287_v40 = vpop.permute.xlu1 %286  ;;  %v278_v41 = vpop.permute.xlu0 %277 }
  0xbd   :  { %585 = vst [vmem:[%s853_s1 + $0x190] sm:$0xff] %v287_v40  ;;  %583 = vst [vmem:[%s853_s1 + $0x90] sm:$0xff] %v278_v41 }
  0xc0   :  { %v304_v42 = vpop.permute.xlu1 %303  ;;  %v295_v43 = vpop.permute.xlu0 %294 }
  0xc1   :  { %589 = vst [vmem:[%s853_s1 + $0x198] sm:$0xff] %v304_v42  ;;  %587 = vst [vmem:[%s853_s1 + $0x98] sm:$0xff] %v295_v43 }
  0xc4   :  { %v321_v44 = vpop.permute.xlu1 %320  ;;  %v312_v45 = vpop.permute.xlu0 %311 }
  0xc5   :  { %593 = vst [vmem:[%s853_s1 + $0x1a0] sm:$0xff] %v321_v44  ;;  %591 = vst [vmem:[%s853_s1 + $0xa0] sm:$0xff] %v312_v45 }
  0xc8   :  { %v338_v46 = vpop.permute.xlu1 %337  ;;  %v329_v47 = vpop.permute.xlu0 %328 }
  0xc9   :  { %597 = vst [vmem:[%s853_s1 + $0x1a8] sm:$0xff] %v338_v46  ;;  %595 = vst [vmem:[%s853_s1 + $0xa8] sm:$0xff] %v329_v47 }
  0xcc   :  { %v355_v48 = vpop.permute.xlu1 %354  ;;  %v346_v49 = vpop.permute.xlu0 %345 }
  0xcd   :  { %601 = vst [vmem:[%s853_s1 + $0x1b0] sm:$0xff] %v355_v48  ;;  %599 = vst [vmem:[%s853_s1 + $0xb0] sm:$0xff] %v346_v49 }
  0xd0   :  { %v372_v50 = vpop.permute.xlu1 %371  ;;  %v363_v51 = vpop.permute.xlu0 %362 }
  0xd1   :  { %605 = vst [vmem:[%s853_s1 + $0x1b8] sm:$0xff] %v372_v50  ;;  %603 = vst [vmem:[%s853_s1 + $0xb8] sm:$0xff] %v363_v51 }
  0xd4   :  { %v389_v52 = vpop.permute.xlu1 %388  ;;  %v380_v53 = vpop.permute.xlu0 %379 }
  0xd5   :  { %609 = vst [vmem:[%s853_s1 + $0x1c0] sm:$0xff] %v389_v52  ;;  %607 = vst [vmem:[%s853_s1 + $0xc0] sm:$0xff] %v380_v53 }
  0xd8   :  { %v406_v54 = vpop.permute.xlu1 %405  ;;  %v397_v55 = vpop.permute.xlu0 %396 }
  0xd9   :  { %613 = vst [vmem:[%s853_s1 + $0x1c8] sm:$0xff] %v406_v54  ;;  %611 = vst [vmem:[%s853_s1 + $0xc8] sm:$0xff] %v397_v55 }
  0xdc   :  { %v423_v56 = vpop.permute.xlu1 %422  ;;  %v414_v57 = vpop.permute.xlu0 %413 }
  0xdd   :  { %617 = vst [vmem:[%s853_s1 + $0x1d0] sm:$0xff] %v423_v56  ;;  %615 = vst [vmem:[%s853_s1 + $0xd0] sm:$0xff] %v414_v57 }
  0xe0   :  { %v440_v58 = vpop.permute.xlu1 %439  ;;  %v431_v59 = vpop.permute.xlu0 %430 }
  0xe1   :  { %621 = vst [vmem:[%s853_s1 + $0x1d8] sm:$0xff] %v440_v58  ;;  %619 = vst [vmem:[%s853_s1 + $0xd8] sm:$0xff] %v431_v59 }
  0xe4   :  { %v457_v60 = vpop.permute.xlu1 %456  ;;  %v448_v61 = vpop.permute.xlu0 %447 }
  0xe5   :  { %625 = vst [vmem:[%s853_s1 + $0x1e0] sm:$0xff] %v457_v60  ;;  %623 = vst [vmem:[%s853_s1 + $0xe0] sm:$0xff] %v448_v61 }
  0xe8   :  { %v474_v62 = vpop.permute.xlu1 %473  ;;  %v465_v63 = vpop.permute.xlu0 %464 }
  0xe9   :  { %629 = vst [vmem:[%s853_s1 + $0x1e8] sm:$0xff] %v474_v62  ;;  %627 = vst [vmem:[%s853_s1 + $0xe8] sm:$0xff] %v465_v63 }
  0xec   :  { %v491_v0 = vpop.permute.xlu1 %490  ;;  %v482_v1 = vpop.permute.xlu0 %481 }
  0xed   :  { %633 = vst [vmem:[%s853_s1 + $0x1f0] sm:$0xff] %v491_v0  ;;  %631 = vst [vmem:[%s853_s1 + $0xf0] sm:$0xff] %v482_v1 }
  0xf0   :  { %v508_v2 = vpop.permute.xlu1 %507  ;;  %v499_v3 = vpop.permute.xlu0 %498 }
  0xf1   :  { %637 = vst [vmem:[%s853_s1 + $0x1f8] sm:$0xff] %v508_v2  ;;  %635 = vst [vmem:[%s853_s1 + $0xf8] sm:$0xff] %v499_v3 }

// kernel: cnn_patch_encoder.1
= control target key start
LH: loop header
LB: loop body
LE: loop exit
PB: predicated region body
PF: predicated region fallthrough
CT: control target
= control target key end

     0   :  { %14 = vsyncpa [#allocation5], 0  ;;  %s3252_s0 = inlined_call_operand.vmem [shape: f32[2,260,1], index: 0, kind: input, shape index: {}]   ;;  %s3253_s1 = inlined_call_operand.vmem [shape: f32[8,1,8], index: 1, kind: input, shape index: {}]   ;;  %s3254_s2 = inlined_call_operand.vmem [shape: f32[1,8], index: 2, kind: input, shape index: {}]   ;;  %s3255_s3 = inlined_call_operand.vmem [shape: f32[4,8,64], index: 3, kind: input, shape index: {}]   ;;  %s3256_s4 = inlined_call_operand.vmem [shape: f32[32,64], index: 4, kind: input, shape index: {}]   ;;  %s3257_s5 = inlined_call_operand.vmem [shape: f32[4,64,128], index: 5, kind: input, shape index: {}]   ;;  %s3258_s6 = inlined_call_operand.vmem [shape: f32[16,128], index: 6, kind: input, shape index: {}]   ;;  %s3259_s7 = inlined_call_operand.vmem [shape: f32[128,128], index: 7, kind: input, shape index: {}]   ;;  %s3260_s8 = inlined_call_operand.vmem [shape: f32[1,128], index: 8, kind: input, shape index: {}]   ;;  %s3261_s9 = inlined_call_operand.hbm [shape: f32[2,16,128], index: 9, kind: output, shape index: {}]  }
   0x1   :  { %16 = vsyncpa [#allocation5 + $0x1], 0  ;;  %s2689_s30 = smov 0   ;;  %s2691_s10 = smov 0  }
   0x2   :  { %s2693_s11 = smov 0   ;;  %s2695_s12 = smov 0  }
   0x3 LB: > { %s2710_s13 = sadd.s32 4294967295, %s2632_s12   ;;  %s2046_s14 = sadd.s32 4294967294, %s2632_s12   ;;  %s2632_s12 = sphi %s2695_s12, %s3267_s12   ;;  %s2628_s11 = sphi %s2693_s11, %s3266_s11   ;;  %s2624_s10 = sphi %s2691_s10, %s3265_s10   ;;  %s2620_s30 = sphi %s2689_s30, %s3264_s30  }
   0x4   : > { %s2714_s15 = sadd.s32 1, %s2632_s12   ;;  %s223_s16 = sadd.s32 1, %s2628_s11 }
   0x5   : > { %s220_s17 = ssub.s32 %s2632_s12, %s2714_s15  ;;  %p233_p0 = scmp.ne.s32.totalorder %s2628_s11, %s2624_s10 }
   0x6   : > { %p221_p1 = scmp.eq.s32.totalorder %s220_s17, 0  ;;  %p234_p2 = scmp.eq.s32.totalorder %s2710_s13, 1 }
   0x7   : > { %p239_p3 = scmp.ne.s32.totalorder %s2624_s10, %s2620_s30  ;;  %p240_p4 = scmp.eq.s32.totalorder %s2046_s14, 1 }
   0x8   : > { %s2725_s18 = scalar_select %p221_p1, %s2628_s11, %s223_s16  }
   0x9   : > { %p2727_p5 = por %p234_p2, %p233_p0  ;;  %p2731_p6 = por %p240_p4, %p239_p3 }
   0xa   : > { %p2049_p7 = scmp.ge.s32.totalorder %s2632_s12, 1  ;;  %p290_p8 = scmp.lt.s32.totalorder %s2632_s12, 3 }
   0xc   : > { %p291_p9 = pnand %p2049_p7, %p290_p8 }
   0xd   : > { %p326_p10 = scmp.lt.s32.totalorder (!%p291_p9), %s2710_s13, 1  ;;  %v2634_v0 = vmov (!%p291_p9), 0   ;;  %vm1008_vm0 = vcmask (!%p291_p9), 57344   ;;  %v2635_v59 = vmov (!%p291_p9), 0.0   ;;  %vm1011_vm1 = vcmask (!%p291_p9), 64512   ;;  %s323_s28 = sand.u32 (!%p291_p9), 1, %s2624_s10  }
   0xe   : > { %294 = sbr.rel (%p291_p9) target bundleno = 1044 (0x414), region = 56  ;;  %2569 = vset.pattern.permute.xlu1 (!%p291_p9), %v2634_v0  ;;  %2568 = vset.pattern.permute.xlu0 (!%p291_p9), %v2634_v0  ;;  %1009 = vst.msk [vmem:[#allocation2] sm:$0x1] (!%p291_p9), %vm1008_vm0, %v2635_v59  ;;  %1010 = vst.msk [vmem:[#allocation2 + $0x41] sm:$0x1] (!%p291_p9), %vm1008_vm0, %v2635_v59  ;;  %vm1474_vm10 = vcmask (!%p291_p9), 516096  }
   0xf   : > { %1475 = vst.msk [vmem:[#allocation3] sm:$0x1] (!%p291_p9), %vm1474_vm10, %v2635_v59  ;;  %1476 = vst.msk [vmem:[#allocation3 + $0x21] sm:$0x1] (!%p291_p9), %vm1474_vm10, %v2635_v59  ;;  %v1486_v59 = vld [vmem:[%s3257_s5 + $0x8] sm:$0xff] (!%p291_p9)  ;;  %vm1477_vm12 = vcmask (!%p291_p9), 523264  }
  0x10   : > { %s2050_s29 = sshll.u32 (!%p291_p9), %s323_s28, 4  ;;  %s3211_s26 = scalar_lea.sflag (!%p291_p9), [#allocation5], %s323_s28 }
  0x11   : > { %s325_s17 = scalar_lea.vmem (!%p291_p9), [#allocation4], %s2050_s29 }
  0x15   : > { %s327_s21 = scalar_select %p326_p10, %s2710_s13, 1 }
  0x17   : > { %s2524_s22 = smul.u32 264, %s327_s21  ;;  %s1984_s21 = sshll.u32 %s325_s17, 4  ;;  %s3204_s21 = int_to_ptr.vmem [resolvable:$true] %s1984_s21 }
  0x18   : > { %s2570_s27 = scalar_lea.vmem %s3204_s21, 256 }
  0x19   : > { %s2742_s25 = scalar_lea.vmem %s3252_s0, %s2524_s22  ;;  %s2188_s22 = sshll.u32 %s2710_s13, 8 }
  0x1a   : > { %v2060_v1 = vld [vmem:[%s2742_s25 + $0x1] ss:$4 sm:$0xff]  ;;  %v331_v2 = vld [vmem:[%s2742_s25] ss:$4 sm:$0xff]  ;;  %v2071_v9 = vld [vmem:[%s2742_s25 + $0x22] ss:$4 sm:$0xff]  ;;  %p2571_p11 = scmp.ne.s32.totalorder %s3204_s21, %s2570_s27 }
  0x1b   : > { %429 = vperm.xlu1 %2569, %v2060_v1   ;;  %349 = vperm.xlu0 %2568, %v331_v2   ;;  %v2061_v3 = vld [vmem:[%s2742_s25 + $0x21] ss:$4 sm:$0xff]  ;;  %v2052_v4 = vld [vmem:[%s2742_s25 + $0x20] ss:$4 sm:$0xff]  ;;  %v2070_v10 = vld [vmem:[%s2742_s25 + $0x2] ss:$4 sm:$0xff] }
  0x1c   : > { %v2054_v5 = vld [vmem:[%s2742_s25 + $0x60] ss:$4 sm:$0xff]  ;;  %v2063_v7 = vld [vmem:[%s2742_s25 + $0x61] ss:$4 sm:$0xff]  ;;  %v2073_v11 = vld [vmem:[%s2742_s25 + $0x62] ss:$4 sm:$0xff]  ;;  %p2572_p12 = pnand %p2571_p11, %p2727_p5 }
  0x1d   : > { %v2053_v6 = vld [vmem:[%s2742_s25 + $0x40] ss:$4 sm:$0xff]  ;;  %v2062_v8 = vld [vmem:[%s2742_s25 + $0x41] ss:$4 sm:$0xff]  ;;  %v2072_v12 = vld [vmem:[%s2742_s25 + $0x42] ss:$4 sm:$0xff] }
  0x1e   : > { %v2056_v13 = vld [vmem:[%s2742_s25 + $0xa0] ss:$4 sm:$0xff]  ;;  %v2065_v15 = vld [vmem:[%s2742_s25 + $0xa1] ss:$4 sm:$0xff]  ;;  %v2081_v17 = vld [vmem:[%s2742_s25 + $0x23] ss:$4 sm:$0xff]  ;;  %p2573_p13 = pneg %p2572_p12 }
  0x1f   : > { %434 = vperm.xlu1 %2569, %v2061_v3   ;;  %354 = vperm.xlu0 %2568, %v2052_v4   ;;  %v2055_v14 = vld [vmem:[%s2742_s25 + $0x80] ss:$4 sm:$0xff]  ;;  %v2064_v16 = vld [vmem:[%s2742_s25 + $0x81] ss:$4 sm:$0xff]  ;;  %v2080_v18 = vld [vmem:[%s2742_s25 + $0x3] ss:$4 sm:$0xff] }
  0x20   : > { %v2058_v19 = vld [vmem:[%s2742_s25 + $0xe0] ss:$4 sm:$0xff]  ;;  %v2067_v21 = vld [vmem:[%s2742_s25 + $0xe1] ss:$4 sm:$0xff]  ;;  %v2083_v23 = vld [vmem:[%s2742_s25 + $0x63] ss:$4 sm:$0xff] }
  0x21   : > { %v2057_v20 = vld [vmem:[%s2742_s25 + $0xc0] ss:$4 sm:$0xff]  ;;  %v2066_v22 = vld [vmem:[%s2742_s25 + $0xc1] ss:$4 sm:$0xff]  ;;  %v2082_v24 = vld [vmem:[%s2742_s25 + $0x43] ss:$4 sm:$0xff] }
  0x22   : > { %v2075_v25 = vld [vmem:[%s2742_s25 + $0xa2] ss:$4 sm:$0xff]  ;;  %v2091_v27 = vld [vmem:[%s2742_s25 + $0x24] ss:$4 sm:$0xff]  ;;  %v2085_v33 = vld [vmem:[%s2742_s25 + $0xa3] ss:$4 sm:$0xff] }
  0x23   : > { %364 = vperm.xlu1 %2569, %v2054_v5   ;;  %359 = vperm.xlu0 %2568, %v2053_v6   ;;  %v2074_v26 = vld [vmem:[%s2742_s25 + $0x82] ss:$4 sm:$0xff]  ;;  %v2090_v28 = vld [vmem:[%s2742_s25 + $0x4] ss:$4 sm:$0xff]  ;;  %v2084_v34 = vld [vmem:[%s2742_s25 + $0x83] ss:$4 sm:$0xff] }
  0x24   : > { %v2077_v29 = vld [vmem:[%s2742_s25 + $0xe2] ss:$4 sm:$0xff]  ;;  %v2093_v31 = vld [vmem:[%s2742_s25 + $0x64] ss:$4 sm:$0xff]  ;;  %v2101_v35 = vld [vmem:[%s2742_s25 + $0x25] ss:$4 sm:$0xff] }
  0x25   : > { %v2076_v30 = vld [vmem:[%s2742_s25 + $0xc2] ss:$4 sm:$0xff]  ;;  %v2092_v32 = vld [vmem:[%s2742_s25 + $0x44] ss:$4 sm:$0xff]  ;;  %v2100_v36 = vld [vmem:[%s2742_s25 + $0x5] ss:$4 sm:$0xff] }
  0x26   : > { %v2087_v37 = vld [vmem:[%s2742_s25 + $0xe3] ss:$4 sm:$0xff]  ;;  %v2103_v39 = vld [vmem:[%s2742_s25 + $0x65] ss:$4 sm:$0xff]  ;;  %v2095_v41 = vld [vmem:[%s2742_s25 + $0xa4] ss:$4 sm:$0xff] }
  0x27   : > { %444 = vperm.xlu1 %2569, %v2063_v7   ;;  %439 = vperm.xlu0 %2568, %v2062_v8   ;;  %v2086_v38 = vld [vmem:[%s2742_s25 + $0xc3] ss:$4 sm:$0xff]  ;;  %v2102_v40 = vld [vmem:[%s2742_s25 + $0x45] ss:$4 sm:$0xff]  ;;  %v2094_v42 = vld [vmem:[%s2742_s25 + $0x84] ss:$4 sm:$0xff] }
  0x28   : > { %v2111_v43 = vld [vmem:[%s2742_s25 + $0x26] ss:$4 sm:$0xff]  ;;  %v2097_v45 = vld [vmem:[%s2742_s25 + $0xe4] ss:$4 sm:$0xff]  ;;  %v2105_v49 = vld [vmem:[%s2742_s25 + $0xa5] ss:$4 sm:$0xff] }
  0x29   : > { %v2110_v44 = vld [vmem:[%s2742_s25 + $0x6] ss:$4 sm:$0xff]  ;;  %v2096_v46 = vld [vmem:[%s2742_s25 + $0xc4] ss:$4 sm:$0xff]  ;;  %v2104_v50 = vld [vmem:[%s2742_s25 + $0x85] ss:$4 sm:$0xff] }
  0x2a   : > { %v2113_v47 = vld [vmem:[%s2742_s25 + $0x66] ss:$4 sm:$0xff]  ;;  %v2121_v51 = vld [vmem:[%s2742_s25 + $0x27] ss:$4 sm:$0xff]  ;;  %v2107_v53 = vld [vmem:[%s2742_s25 + $0xe5] ss:$4 sm:$0xff] }
  0x2b   : > { %514 = vperm.xlu1 %2569, %v2071_v9   ;;  %509 = vperm.xlu0 %2568, %v2070_v10   ;;  %v2112_v48 = vld [vmem:[%s2742_s25 + $0x46] ss:$4 sm:$0xff]  ;;  %v2120_v52 = vld [vmem:[%s2742_s25 + $0x7] ss:$4 sm:$0xff]  ;;  %v2106_v54 = vld [vmem:[%s2742_s25 + $0xc5] ss:$4 sm:$0xff] }
  0x2c   : > { %v2123_v55 = vld [vmem:[%s2742_s25 + $0x67] ss:$4 sm:$0xff]  ;;  %v2115_v57 = vld [vmem:[%s2742_s25 + $0xa6] ss:$4 sm:$0xff]  ;;  %v2069_v3 = vld [vmem:[%s3253_s1 + $0x1] ss:$0 sm:$0xff] }
  0x2d   : > { %v2122_v56 = vld [vmem:[%s2742_s25 + $0x47] ss:$4 sm:$0xff]  ;;  %v2114_v58 = vld [vmem:[%s2742_s25 + $0x86] ss:$4 sm:$0xff]  ;;  %v2059_v4 = vld [vmem:[%s3253_s1] ss:$0 sm:$0xff] }
  0x2e   : > { %v2117_v60 = vld [vmem:[%s2742_s25 + $0xe6] ss:$4 sm:$0xff]  ;;  %v2125_v62 = vld [vmem:[%s2742_s25 + $0xa7] ss:$4 sm:$0xff]  ;;  %s2636_s13 = smov [#allocation4]  }
  0x2f   : > { %524 = vperm.xlu1 %2569, %v2073_v11   ;;  %519 = vperm.xlu0 %2568, %v2072_v12   ;;  %v2116_v61 = vld [vmem:[%s2742_s25 + $0xc6] ss:$4 sm:$0xff]  ;;  %v2124_v63 = vld [vmem:[%s2742_s25 + $0x87] ss:$4 sm:$0xff]  ;;  %s2574_s29 = sshll.u32 %s2636_s13, 4  ;;  %s2575_s29 = int_to_ptr.vmem [resolvable:$false] %s2574_s29 }
  0x30   : > { %v2127_v0 = vld [vmem:[%s2742_s25 + $0xe7] ss:$4 sm:$0xff]  ;;  %s2576_s14 = scalar_lea.vmem %s2575_s29, 512  ;;  %p2577_p0 = scmp.lt.s32.totalorder %s3204_s21, %s2575_s29 }
  0x31   : > { %v2126_v1 = vld [vmem:[%s2742_s25 + $0xc7] ss:$4 sm:$0xff]  ;;  %s3209_s25 = scalar_lea.hbm %s3261_s9, %s2188_s22  ;;  %p2578_p1 = scmp.lt.s32.totalorder %s2576_s14, %s2570_s27 }
  0x32   : > { %v2131_v2 = vld [vmem:[%s3255_s3 + $0x8] sm:$0xff] }
  0x33   : > { %374 = vperm.xlu1 %2569, %v2056_v13   ;;  %369 = vperm.xlu0 %2568, %v2055_v14   ;;  %p2579_p2 = por %p2578_p1, %p2577_p0 }
  0x34   : > { %2267 = vmatprep.subr.mxu0 %v2131_v2 }
  0x35   : > { %2268 = vmatpush3.msra.mxu0 %v2131_v2  ;;  %p2580_p3 = pnand %p2579_p2, %p2573_p13 }
  0x37   : > { %454 = vperm.xlu1 %2569, %v2065_v15   ;;  %449 = vperm.xlu0 %2568, %v2064_v16   ;;  %v2822_v15 = vld [vmem:[%s3255_s3] sm:$0xff] }
  0x38   : > { %2275 = vmatprep.subr.mxu0 %v2822_v15 }
  0x3b   : > { %594 = vperm.xlu1 %2569, %v2081_v17   ;;  %589 = vperm.xlu0 %2568, %v2080_v18  }
  0x3f   : > { %384 = vperm.xlu1 %2569, %v2058_v19   ;;  %379 = vperm.xlu0 %2568, %v2057_v20  }
  0x43   : > { %464 = vperm.xlu1 %2569, %v2067_v21   ;;  %459 = vperm.xlu0 %2568, %v2066_v22  }
  0x47   : > { %604 = vperm.xlu1 %2569, %v2083_v23   ;;  %599 = vperm.xlu0 %2568, %v2082_v24   ;;  %v2828_v24 = vld [vmem:[%s3253_s1 + $0x2] ss:$0 sm:$0xff] }
  0x4b   : > { %534 = vperm.xlu1 %2569, %v2075_v25   ;;  %529 = vperm.xlu0 %2568, %v2074_v26  }
  0x4f   : > { %674 = vperm.xlu1 %2569, %v2091_v27   ;;  %669 = vperm.xlu0 %2568, %v2090_v28  }
  0x53   : > { %544 = vperm.xlu1 %2569, %v2077_v29   ;;  %539 = vperm.xlu0 %2568, %v2076_v30  }
  0x57   : > { %684 = vperm.xlu1 %2569, %v2093_v31   ;;  %679 = vperm.xlu0 %2568, %v2092_v32  }
  0x5b   : > { %614 = vperm.xlu1 %2569, %v2085_v33   ;;  %609 = vperm.xlu0 %2568, %v2084_v34  }
  0x5f   : > { %754 = vperm.xlu1 %2569, %v2101_v35   ;;  %749 = vperm.xlu0 %2568, %v2100_v36  }
  0x63   : > { %624 = vperm.xlu1 %2569, %v2087_v37   ;;  %619 = vperm.xlu0 %2568, %v2086_v38  }
  0x67   : > { %764 = vperm.xlu1 %2569, %v2103_v39   ;;  %759 = vperm.xlu0 %2568, %v2102_v40  }
  0x6b   : > { %694 = vperm.xlu1 %2569, %v2095_v41   ;;  %689 = vperm.xlu0 %2568, %v2094_v42  }
  0x6f   : > { %834 = vperm.xlu1 %2569, %v2111_v43   ;;  %829 = vperm.xlu0 %2568, %v2110_v44  }
  0x73   : > { %704 = vperm.xlu1 %2569, %v2097_v45   ;;  %699 = vperm.xlu0 %2568, %v2096_v46  }
  0x77   : > { %844 = vperm.xlu1 %2569, %v2113_v47   ;;  %839 = vperm.xlu0 %2568, %v2112_v48  }
  0x7b   : > { %774 = vperm.xlu1 %2569, %v2105_v49   ;;  %769 = vperm.xlu0 %2568, %v2104_v50  }
  0x7f   : > { %914 = vperm.xlu1 %2569, %v2121_v51   ;;  %909 = vperm.xlu0 %2568, %v2120_v52  }
  0x83   : > { %784 = vperm.xlu1 %2569, %v2107_v53   ;;  %779 = vperm.xlu0 %2568, %v2106_v54  }
  0x87   : > { %924 = vperm.xlu1 %2569, %v2123_v55   ;;  %919 = vperm.xlu0 %2568, %v2122_v56  }
  0x8b   : > { %854 = vperm.xlu1 %2569, %v2115_v57   ;;  %849 = vperm.xlu0 %2568, %v2114_v58  }
  0x8f   : > { %864 = vperm.xlu1 %2569, %v2117_v60   ;;  %859 = vperm.xlu0 %2568, %v2116_v61  }
  0x93   : > { %934 = vperm.xlu1 %2569, %v2125_v62   ;;  %929 = vperm.xlu0 %2568, %v2124_v63  }
  0x97   : > { %944 = vperm.xlu1 %2569, %v2127_v0   ;;  %939 = vperm.xlu0 %2568, %v2126_v1  }
  0x9a   : > { %v430_v5 = vpop.permute.xlu1 %429  ;;  %v350_v6 = vpop.permute.xlu0 %349 }
  0x9b   : > { %v473_v7 = vmul.f32 %v2069_v3, %v430_v5  ;;  %v393_v8 = vmul.f32 %v2059_v4, %v350_v6 }
  0x9d   : > { %v481_v9 = vadd.f32 %v473_v7, %v393_v8 }
  0x9e   : > { %v435_v10 = vpop.permute.xlu1 %434  ;;  %v355_v11 = vpop.permute.xlu0 %354 }
  0x9f   : > { %v474_v12 = vmul.f32 %v2069_v3, %v435_v10  ;;  %v394_v13 = vmul.f32 %v2059_v4, %v355_v11 }
  0xa1   : > { %v482_v14 = vadd.f32 %v474_v12, %v394_v13 }
  0xa2   : > { %v365_v16 = vpop.permute.xlu1 %364  ;;  %v360_v17 = vpop.permute.xlu0 %359 }
  0xa3   : > { %v396_v20 = vmul.f32 %v2059_v4, %v365_v16  ;;  %v395_v21 = vmul.f32 %v2059_v4, %v360_v17 }
  0xa6   : > { %v445_v18 = vpop.permute.xlu1 %444  ;;  %v440_v19 = vpop.permute.xlu0 %439 }
  0xa7   : > { %v476_v22 = vmul.f32 %v2069_v3, %v445_v18  ;;  %v475_v23 = vmul.f32 %v2069_v3, %v440_v19 }
  0xa9   : > { %v484_v25 = vadd.f32 %v476_v22, %v396_v20  ;;  %v483_v26 = vadd.f32 %v475_v23, %v395_v21  ;;  %v2873_v21 = vld [vmem:[%s3253_s1 + $0x3] ss:$0 sm:$0xff] }
  0xaa   : > { %v515_v27 = vpop.permute.xlu1 %514  ;;  %v510_v28 = vpop.permute.xlu0 %509 }
  0xab   : > { %v554_v29 = vmul.f32 %v2828_v24, %v515_v27  ;;  %v553_v30 = vmul.f32 %v2828_v24, %v510_v28  ;;  %v2889_v28 = vld [vmem:[%s3253_s1 + $0x5] ss:$0 sm:$0xff] }
  0xad   : > { %v2832_v31 = vadd.f32 %v554_v29, %v482_v14  ;;  %v2834_v32 = vadd.f32 %v553_v30, %v481_v9 }
  0xae   : > { %v525_v33 = vpop.permute.xlu1 %524  ;;  %v520_v34 = vpop.permute.xlu0 %519 }
  0xaf   : > { %v556_v35 = vmul.f32 %v2828_v24, %v525_v33  ;;  %v555_v36 = vmul.f32 %v2828_v24, %v520_v34 }
  0xb1   : > { %v2838_v37 = vadd.f32 %v556_v35, %v484_v25  ;;  %v2840_v38 = vadd.f32 %v555_v36, %v483_v26  ;;  %v2882_v25 = vld [vmem:[%s3253_s1 + $0x4] ss:$0 sm:$0xff]  ;;  %v2896_v35 = vld [vmem:[%s3253_s1 + $0x6] ss:$0 sm:$0xff] }
  0xb2   : > { %v375_v39 = vpop.permute.xlu1 %374  ;;  %v370_v40 = vpop.permute.xlu0 %369 }
  0xb3   : > { %v398_v43 = vmul.f32 %v2059_v4, %v375_v39  ;;  %v397_v44 = vmul.f32 %v2059_v4, %v370_v40 }
  0xb6   : > { %v455_v41 = vpop.permute.xlu1 %454  ;;  %v450_v42 = vpop.permute.xlu0 %449 }
  0xb7   : > { %v478_v45 = vmul.f32 %v2069_v3, %v455_v41  ;;  %v477_v46 = vmul.f32 %v2069_v3, %v450_v42 }
  0xb9   : > { %v2842_v47 = vadd.f32 %v478_v45, %v398_v43  ;;  %v2844_v48 = vadd.f32 %v477_v46, %v397_v44 }
  0xba   : > { %v595_v49 = vpop.permute.xlu1 %594  ;;  %v590_v50 = vpop.permute.xlu0 %589 }
  0xbb   : > { %v634_v26 = vmul.f32 %v2873_v21, %v595_v49  ;;  %v633_v27 = vmul.f32 %v2873_v21, %v590_v50 }
  0xbd   : > { %v642_v36 = vadd.f32 %v634_v26, %v2832_v31  ;;  %v641_v39 = vadd.f32 %v633_v27, %v2834_v32  ;;  %v2913_v32 = vld [vmem:[%s3253_s1 + $0x7] ss:$0 sm:$0xff] }
  0xbe   : > { %v385_v51 = vpop.permute.xlu1 %384  ;;  %v380_v52 = vpop.permute.xlu0 %379 }
  0xbf   : > { %v400_v55 = vmul.f32 %v2059_v4, %v385_v51  ;;  %v399_v56 = vmul.f32 %v2059_v4, %v380_v52 }
  0xc2   : > { %v465_v53 = vpop.permute.xlu1 %464  ;;  %v460_v54 = vpop.permute.xlu0 %459 }
  0xc3   : > { %v480_v57 = vmul.f32 %v2069_v3, %v465_v53  ;;  %v479_v58 = vmul.f32 %v2069_v3, %v460_v54 }
  0xc5   : > { %v2846_v60 = vadd.f32 %v480_v57, %v400_v55  ;;  %v2848_v61 = vadd.f32 %v479_v58, %v399_v56 }
  0xc6   : > { %v605_v62 = vpop.permute.xlu1 %604  ;;  %v600_v63 = vpop.permute.xlu0 %599 }
  0xc7   : > { %v636_v50 = vmul.f32 %v2873_v21, %v605_v62  ;;  %v635_v31 = vmul.f32 %v2873_v21, %v600_v63 }
  0xc9   : > { %v644_v63 = vadd.f32 %v636_v50, %v2838_v37 }
  0xca   : > { %v2850_v0 = vpop.permute.xlu1 %534  ;;  %v2852_v1 = vpop.permute.xlu0 %529 }
  0xce   : > { %v675_v2 = vpop.permute.xlu1 %674  ;;  %v670_v5 = vpop.permute.xlu0 %669 }
  0xcf   : > { %v714_v33 = vmul.f32 %v2882_v25, %v675_v2  ;;  %v713_v34 = vmul.f32 %v2882_v25, %v670_v5  ;;  %v643_v5 = vadd.f32 %v635_v31, %v2840_v38 }
  0xd1   : > { %v722_v44 = vadd.f32 %v714_v33, %v642_v36  ;;  %v721_v45 = vadd.f32 %v713_v34, %v641_v39 }
  0xd2   : > { %v2854_v6 = vpop.permute.xlu1 %544  ;;  %v2856_v7 = vpop.permute.xlu0 %539 }
  0xd6   : > { %v685_v8 = vpop.permute.xlu1 %684  ;;  %v680_v4 = vpop.permute.xlu0 %679 }
  0xd7   : > { %v716_v53 = vmul.f32 %v2882_v25, %v685_v8  ;;  %v715_v54 = vmul.f32 %v2882_v25, %v680_v4  ;;  %v2926_v8 = vld [vmem:[%s3254_s2] ss:$0 sm:$0xff] }
  0xd9   : > { %v723_v26 = vadd.f32 %v715_v54, %v643_v5 }
  0xda   : > { %v2858_v9 = vpop.permute.xlu1 %614  ;;  %v2860_v3 = vpop.permute.xlu0 %609 }
  0xde   : > { %v755_v10 = vpop.permute.xlu1 %754  ;;  %v750_v11 = vpop.permute.xlu0 %749 }
  0xdf   : > { %v794_v40 = vmul.f32 %v2889_v28, %v755_v10  ;;  %v793_v41 = vmul.f32 %v2889_v28, %v750_v11 }
  0xe1   : > { %v802_v51 = vadd.f32 %v794_v40, %v722_v44  ;;  %v801_v52 = vadd.f32 %v793_v41, %v721_v45 }
  0xe2   : > { %v2862_v12 = vpop.permute.xlu1 %624  ;;  %v2864_v13 = vpop.permute.xlu0 %619 }
  0xe6   : > { %v765_v14 = vpop.permute.xlu1 %764  ;;  %v760_v16 = vpop.permute.xlu0 %759 }
  0xe7   : > { %v796_v10 = vmul.f32 %v2889_v28, %v765_v14  ;;  %v795_v11 = vmul.f32 %v2889_v28, %v760_v16 }
  0xe9   : > { %v803_v36 = vadd.f32 %v795_v11, %v723_v26 }
  0xea   : > { %v2866_v17 = vpop.permute.xlu1 %694  ;;  %v2868_v18 = vpop.permute.xlu0 %689 }
  0xee   : > { %v835_v19 = vpop.permute.xlu1 %834  ;;  %v830_v20 = vpop.permute.xlu0 %829 }
  0xef   : > { %v874_v46 = vmul.f32 %v2896_v35, %v835_v19  ;;  %v873_v49 = vmul.f32 %v2896_v35, %v830_v20  ;;  %v724_v20 = vadd.f32 %v716_v53, %v644_v63  ;;  %v637_v53 = vmul.f32 %v2873_v21, %v2860_v3 }
  0xf0   : > { %v560_v3 = vmul.f32 %v2828_v24, %v2854_v6  ;;  %v640_v6 = vmul.f32 %v2873_v21, %v2862_v12 }
  0xf1   : > { %v882_v57 = vadd.f32 %v874_v46, %v802_v51  ;;  %v881_v58 = vadd.f32 %v873_v49, %v801_v52  ;;  %v804_v34 = vadd.f32 %v796_v10, %v724_v20  ;;  %v638_v52 = vmul.f32 %v2873_v21, %v2858_v9 }
  0xf2   : > { %v2875_v22 = vpop.permute.xlu1 %704  ;;  %v2877_v23 = vpop.permute.xlu0 %699 }
  0xf3   : > { %v720_v12 = vmul.f32 %v2882_v25, %v2875_v22 }
  0xf6   : > { %v845_v29 = vpop.permute.xlu1 %844  ;;  %v840_v30 = vpop.permute.xlu0 %839 }
  0xf7   : > { %v876_v27 = vmul.f32 %v2896_v35, %v845_v29  ;;  %v875_v33 = vmul.f32 %v2896_v35, %v840_v30  ;;  %v558_v29 = vmul.f32 %v2828_v24, %v2850_v0  ;;  %v557_v30 = vmul.f32 %v2828_v24, %v2852_v1 }
  0xf9   : > { %v884_v41 = vadd.f32 %v876_v27, %v804_v34  ;;  %v883_v44 = vadd.f32 %v875_v33, %v803_v36  ;;  %v566_v54 = vadd.f32 %v558_v29, %v2842_v47  ;;  %v568_v33 = vadd.f32 %v560_v3, %v2846_v60 }
  0xfa   : > { %v2902_v42 = vpop.permute.xlu1 %774  ;;  %v2904_v43 = vpop.permute.xlu0 %769 }
  0xfb   : > { %v646_v63 = vadd.f32 %v638_v52, %v566_v54  ;;  %v648_v34 = vadd.f32 %v640_v6, %v568_v33 }
  0xfe   : > { %v915_v55 = vpop.permute.xlu1 %914  ;;  %v910_v56 = vpop.permute.xlu0 %909 }
  0xff   : > { %v954_v2 = vmul.f32 %v2913_v32, %v915_v55  ;;  %v953_v62 = vmul.f32 %v2913_v32, %v910_v56  ;;  %v565_v55 = vadd.f32 %v557_v30, %v2844_v48  ;;  %v718_v56 = vmul.f32 %v2882_v25, %v2866_v17 }
 0x100   : > { %v798_v17 = vmul.f32 %v2889_v28, %v2902_v42  ;;  %v728_v30 = vadd.f32 %v720_v12, %v648_v34  ;;  %v2153_v12 = vld [vmem:[%s3257_s5 + $0x58] sm:$0xff] }
 0x101   : > { %v962_v4 = vadd.f32 %v954_v2, %v882_v57  ;;  %v961_v19 = vadd.f32 %v953_v62, %v881_v58  ;;  %v717_v57 = vmul.f32 %v2882_v25, %v2868_v18  ;;  %v559_v2 = vmul.f32 %v2828_v24, %v2856_v7 }
 0x102   : > { %v2930_v37 = vpop.permute.xlu1 %784  ;;  %v2932_v38 = vpop.permute.xlu0 %779  ;;  %v645_v48 = vadd.f32 %v637_v53, %v565_v55  ;;  %v797_v18 = vmul.f32 %v2889_v28, %v2904_v43  ;;  %v639_v24 = vmul.f32 %v2873_v21, %v2864_v13  ;;  %v726_v7 = vadd.f32 %v718_v56, %v646_v63 }
 0x103   : > { %v977_v14 = vadd.f32 %v2926_v8, %v962_v4  ;;  %v976_v16 = vadd.f32 %v2926_v8, %v961_v19  ;;  %v719_v13 = vmul.f32 %v2882_v25, %v2877_v23  ;;  %v800_v60 = vmul.f32 %v2889_v28, %v2930_v37 }
 0x104   : > { %v725_v11 = vadd.f32 %v717_v57, %v645_v48  ;;  %v806_v21 = vadd.f32 %v798_v17, %v726_v7 }
 0x105   : > { %vm985_vm2 = vcmp.gt.f32.partialorder %v977_v14, 0.0  ;;  %v993_v39 = vmul.f32 0.01, %v977_v14  ;;  %vm984_vm3 = vcmp.gt.f32.partialorder %v976_v16, 0.0  ;;  %v992_v40 = vmul.f32 0.01, %v976_v16 }
 0x106   : > { %v925_v45 = vpop.permute.xlu1 %924  ;;  %v920_v46 = vpop.permute.xlu0 %919  ;;  %v808_v37 = vadd.f32 %v800_v60, %v728_v30  ;;  %v2157_v60 = vld [vmem:[%s3257_s5 + $0x78] sm:$0xff] }
 0x107   : > { %v1001_v49 = vsel %vm985_vm2, %v977_v14, %v993_v39  ;;  %v1000_v50 = vsel %vm984_vm3, %v976_v16, %v992_v40  ;;  %v956_v31 = vmul.f32 %v2913_v32, %v925_v45  ;;  %v955_v51 = vmul.f32 %v2913_v32, %v920_v46  ;;  %v1873_v30 = vld [vmem:[%s3259_s7 + $0x18] sm:$0xff] }
 0x108   : > { %1013 = vst.msk [vmem:[#allocation2 + $0x9] sm:$0xff] %vm1011_vm1, %v1001_v49  ;;  %1012 = vst.msk [vmem:[#allocation2 + $0x1] sm:$0xff] %vm1011_vm1, %v1000_v50  ;;  %v567_v14 = vadd.f32 %v559_v2, %v2848_v61  ;;  %v805_v16 = vadd.f32 %v797_v18, %v725_v11  ;;  %v799_v61 = vmul.f32 %v2889_v28, %v2932_v38 }
 0x109   : > { %v964_v0 = vadd.f32 %v956_v31, %v884_v41  ;;  %v963_v1 = vadd.f32 %v955_v51, %v883_v44 }
 0x10a   : > { %v855_v9 = vpop.permute.xlu1 %854  ;;  %v850_v58 = vpop.permute.xlu0 %849  ;;  %v647_v36 = vadd.f32 %v639_v24, %v567_v14  ;;  %v2152_v14 = vld [vmem:[%s3257_s5 + $0x50] sm:$0xff] }
 0x10b   : > { %v979_v62 = vadd.f32 %v2926_v8, %v964_v0  ;;  %v978_v47 = vadd.f32 %v2926_v8, %v963_v1  ;;  %v878_v42 = vmul.f32 %v2896_v35, %v855_v9  ;;  %v877_v43 = vmul.f32 %v2896_v35, %v850_v58  ;;  %v2140_v1 = vld [vmem:[%s3255_s3 + $0x10] sm:$0xff] }
 0x10c   : > { %v727_v41 = vadd.f32 %v719_v13, %v647_v36  ;;  %v2414_v13 = vpack.c.bf16 %v2153_v12, %v2152_v14  ;;  %v2156_v36 = vld [vmem:[%s3257_s5 + $0x70] sm:$0xff] }
 0x10d   : > { %vm987_vm4 = vcmp.gt.f32.partialorder %v979_v62, 0.0  ;;  %v995_v5 = vmul.f32 0.01, %v979_v62  ;;  %vm986_vm5 = vcmp.gt.f32.partialorder %v978_v47, 0.0  ;;  %v994_v10 = vmul.f32 0.01, %v978_v47 }
 0x10e   : > { %v865_v4 = vpop.permute.xlu1 %864  ;;  %v860_v19 = vpop.permute.xlu0 %859  ;;  %v886_v40 = vadd.f32 %v878_v42, %v806_v21  ;;  %v885_v23 = vadd.f32 %v877_v43, %v805_v16  ;;  %v807_v50 = vadd.f32 %v799_v61, %v727_v41  ;;  %v2150_v43 = vld [vmem:[%s3257_s5 + $0x40] sm:$0xff]  ;;  %v2155_v16 = vld [vmem:[%s3257_s5 + $0x68] sm:$0xff]  ;;  %v2422_v61 = vpack.c.bf16 %v2157_v60, %v2156_v36  ;;  %v2164_v12 = vld [vmem:[%s3257_s5 + $0x90] sm:$0xff] }
 0x10f   : > { %v1003_v20 = vsel %vm987_vm4, %v979_v62, %v995_v5  ;;  %v1002_v26 = vsel %vm986_vm5, %v978_v47, %v994_v10  ;;  %v1029_v27 = vld [vmem:[#allocation2 + $0x1] ss:$2 sm:$0xff]  ;;  %v880_v44 = vmul.f32 %v2896_v35, %v865_v4  ;;  %v879_v45 = vmul.f32 %v2896_v35, %v860_v19  ;;  %v1020_v18 = vld [vmem:[#allocation2] ss:$2 sm:$0xff]  ;;  %v2145_v5 = vld [vmem:[%s3255_s3 + $0x18] sm:$0xff] }
 0x110   : > { %1015 = vst.msk [vmem:[#allocation2 + $0x19] sm:$0xff] %vm1011_vm1, %v1003_v20  ;;  %1014 = vst.msk [vmem:[#allocation2 + $0x11] sm:$0xff] %vm1011_vm1, %v1002_v26  ;;  %2269 = vmatprep.mubr.msk.f32.mxu0 %vm1011_vm1, %v1029_v27  ;;  %v1233_v24 = vld [vmem:[#allocation2 + $0x2] ss:$2 sm:$0xff] }
 0x111   : > { %v888_v35 = vadd.f32 %v880_v44, %v808_v37  ;;  %v887_v54 = vadd.f32 %v879_v45, %v807_v50  ;;  %v2151_v27 = vld [vmem:[%s3257_s5 + $0x48] sm:$0xff]  ;;  %v2154_v21 = vld [vmem:[%s3257_s5 + $0x60] sm:$0xff]  ;;  %v1877_v37 = vld [vmem:[%s3259_s7 + $0x38] sm:$0xff] }
 0x112   : > { %v935_v22 = vpop.permute.xlu1 %934  ;;  %v930_v39 = vpop.permute.xlu0 %929  ;;  %v2410_v33 = vpack.c.bf16 %v2151_v27, %v2150_v43  ;;  %v2418_v34 = vpack.c.bf16 %v2155_v16, %v2154_v21  ;;  %v1874_v44 = vld [vmem:[%s3259_s7 + $0x20] sm:$0xff]  ;;  %v1875_v45 = vld [vmem:[%s3259_s7 + $0x28] sm:$0xff] }
 0x113   : > { %v958_v25 = vmul.f32 %v2913_v32, %v935_v22  ;;  %v957_v29 = vmul.f32 %v2913_v32, %v930_v39  ;;  %v1485_v22 = vld [vmem:[%s3257_s5] sm:$0xff]  ;;  %v2167_v36 = vld [vmem:[%s3257_s5 + $0xa8] sm:$0xff] }
 0x114   : > { %2411 = vmatprep.subr.bf16.mxu1 %v2410_v33  ;;  %v3051_v39 = vpack.c.bf16 %v1486_v59, %v1485_v22  ;;  %v2162_v27 = vld [vmem:[%s3257_s5 + $0x80] sm:$0xff]  ;;  %v2168_v22 = vld [vmem:[%s3257_s5 + $0xb0] sm:$0xff]  ;;  %v2169_v59 = vld [vmem:[%s3257_s5 + $0xb8] sm:$0xff] }
 0x115   : > { %v966_v46 = vadd.f32 %v958_v25, %v886_v40  ;;  %v965_v49 = vadd.f32 %v957_v29, %v885_v23  ;;  %2413 = vmatpush3.bf16.msra.mxu1 %v2410_v33  ;;  %v1870_v40 = vld [vmem:[%s3259_s7] sm:$0xff]  ;;  %v1871_v23 = vld [vmem:[%s3259_s7 + $0x8] sm:$0xff]  ;;  %v1872_v25 = vld [vmem:[%s3259_s7 + $0x10] sm:$0xff] }
 0x116   : > { %v945_v31 = vpop.permute.xlu1 %944  ;;  %v940_v28 = vpop.permute.xlu0 %939  ;;  %2415 = vmatprep.subr.bf16.mxu1 %v2414_v13  ;;  %v2474_v29 = vpack.c.bf16 %v1871_v23, %v1870_v40  ;;  %v2478_v41 = vpack.c.bf16 %v1873_v30, %v1872_v25  ;;  %v2163_v33 = vld [vmem:[%s3257_s5 + $0x88] sm:$0xff]  ;;  %v2172_v40 = vld [vmem:[%s3257_s5 + $0xc0] sm:$0xff]  ;;  %v2175_v30 = vld [vmem:[%s3257_s5 + $0xd8] sm:$0xff] }
 0x117   : > { %v981_v38 = vadd.f32 %v2926_v8, %v966_v46  ;;  %v980_v51 = vadd.f32 %v2926_v8, %v965_v49  ;;  %v960_v52 = vmul.f32 %v2913_v32, %v945_v31  ;;  %v959_v53 = vmul.f32 %v2913_v32, %v940_v28  ;;  %v1031_v0 = vld [vmem:[#allocation2 + $0x11] ss:$2 sm:$0xff]  ;;  %v1235_v7 = vld [vmem:[#allocation2 + $0x12] ss:$2 sm:$0xff]  ;;  %v1879_v28 = vld [vmem:[%s3259_s7 + $0x48] sm:$0xff] }
 0x118   : > { %2270 = vmatmul.mubr.msk.f32.vlgmr.msra.gmra.mrb[0].mxu0 %vm1011_vm1, %v1031_v0  ;;  %v1344_v19 = vld [vmem:[#allocation2 + $0x3] ss:$2 sm:$0xff]  ;;  %v2482_v46 = vpack.c.bf16 %v1875_v45, %v1874_v44  ;;  %v2442_v14 = vpack.c.bf16 %v2163_v33, %v2162_v27 }
 0x119   : > { %vm989_vm6 = vcmp.gt.f32.partialorder %v981_v38, 0.0  ;;  %v997_v55 = vmul.f32 0.01, %v981_v38  ;;  %vm988_vm7 = vcmp.gt.f32.partialorder %v980_v51, 0.0  ;;  %v996_v56 = vmul.f32 0.01, %v980_v51  ;;  %2276 = vmatpush3.msra.mxu0 %v2822_v15  ;;  %2417 = vmatpush3.bf16.msra.mxu1 %v2414_v13 }
 0x11a   : > { %v968_v57 = vadd.f32 %v960_v52, %v888_v35  ;;  %v967_v9 = vadd.f32 %v959_v53, %v887_v54  ;;  %2283 = vmatprep.subr.mxu0 %v2140_v1  ;;  %2419 = vmatprep.subr.bf16.mxu1 %v2418_v34  ;;  %v1876_v49 = vld [vmem:[%s3259_s7 + $0x30] sm:$0xff]  ;;  %v1878_v31 = vld [vmem:[%s3259_s7 + $0x40] sm:$0xff]  ;;  %v1881_v52 = vld [vmem:[%s3259_s7 + $0x58] sm:$0xff] }
 0x11b   : > { %v1005_v58 = vsel %vm989_vm6, %v981_v38, %v997_v55  ;;  %v1004_v32 = vsel %vm988_vm7, %v980_v51, %v996_v56  ;;  %v2486_v50 = vpack.c.bf16 %v1877_v37, %v1876_v49  ;;  %v2490_v38 = vpack.c.bf16 %v1879_v28, %v1878_v31  ;;  %v1880_v51 = vld [vmem:[%s3259_s7 + $0x50] sm:$0xff]  ;;  %v1455_v0 = vld [vmem:[%s3256_s4 + $0x8] sm:$0xff]  ;;  %v2165_v13 = vld [vmem:[%s3257_s5 + $0x98] sm:$0xff] }
 0x11c   : > { %1017 = vst.msk [vmem:[#allocation2 + $0x29] sm:$0xff] %vm1011_vm1, %v1005_v58  ;;  %1016 = vst.msk [vmem:[#allocation2 + $0x21] sm:$0xff] %vm1011_vm1, %v1004_v32  ;;  %v983_v3 = vadd.f32 %v2926_v8, %v968_v57  ;;  %v982_v2 = vadd.f32 %v2926_v8, %v967_v9  ;;  %v1022_v8 = vld [vmem:[#allocation2 + $0x10] ss:$2 sm:$0xff]  ;;  %v2494_v53 = vpack.c.bf16 %v1881_v52, %v1880_v51  ;;  %v2173_v23 = vld [vmem:[%s3257_s5 + $0xc8] sm:$0xff] }
 0x11d   : > { %2421 = vmatpush3.bf16.msra.mxu1 %v2418_v34  ;;  %v1457_v57 = vld [vmem:[%s3256_s4 + $0x18] sm:$0xff]  ;;  %v1456_v58 = vld [vmem:[%s3256_s4 + $0x10] sm:$0xff]  ;;  %v2446_v21 = vpack.c.bf16 %v2165_v13, %v2164_v12  ;;  %v2166_v34 = vld [vmem:[%s3257_s5 + $0xa0] sm:$0xff]  ;;  %v2458_v25 = vpack.c.bf16 %v2173_v23, %v2172_v40 }
 0x11e   : > { %vm991_vm8 = vcmp.gt.f32.partialorder %v983_v3, 0.0  ;;  %v999_v62 = vmul.f32 0.01, %v983_v3  ;;  %vm990_vm9 = vcmp.gt.f32.partialorder %v982_v2, 0.0  ;;  %v998_v47 = vmul.f32 0.01, %v982_v2  ;;  %2423 = vmatprep.subr.bf16.mxu1 %v2422_v61 }
 0x11f   : > { %v2176_v45 = vld [vmem:[%s3257_s5 + $0xe0] sm:$0xff]  ;;  %v2179_v31 = vld [vmem:[%s3257_s5 + $0xf8] sm:$0xff]  ;;  %v1883_v52 = vld [vmem:[%s3259_s7 + $0x68] sm:$0xff] }
 0x120   : > { %v1007_v63 = vsel %vm991_vm8, %v983_v3, %v999_v62  ;;  %v1006_v48 = vsel %vm990_vm9, %v982_v2, %v998_v47  ;;  %v1882_v51 = vld [vmem:[%s3259_s7 + $0x60] sm:$0xff] }
 0x121   : > { %1019 = vst.msk [vmem:[#allocation2 + $0x39] sm:$0xff] %vm1011_vm1, %v1007_v63  ;;  %1018 = vst.msk [vmem:[#allocation2 + $0x31] sm:$0xff] %vm1011_vm1, %v1006_v48  ;;  %2425 = vmatpush3.bf16.msra.mxu1 %v2422_v61  ;;  %v2450_v61 = vpack.c.bf16 %v2167_v36, %v2166_v34 }
 0x122   : > { %2427 = vmatprep.subr.bf16.mxu1 %v3051_v39 }
 0x123   : > { %v1033_v15 = vld [vmem:[#allocation2 + $0x21] ss:$2 sm:$0xff]  ;;  %v1024_v10 = vld [vmem:[#allocation2 + $0x20] ss:$2 sm:$0xff] }
 0x124   : > { %2272 = vmatprep.mubr.msk.f32.mxu0 %vm1011_vm1, %v1033_v15  ;;  %v1237_v11 = vld [vmem:[#allocation2 + $0x22] ss:$2 sm:$0xff]  ;;  %v1346_v20 = vld [vmem:[#allocation2 + $0x13] ss:$2 sm:$0xff] }
 0x128   : > { %v1035_v17 = vld [vmem:[#allocation2 + $0x31] ss:$2 sm:$0xff]  ;;  %v1026_v6 = vld [vmem:[#allocation2 + $0x30] ss:$2 sm:$0xff] }
 0x129   : > { %2273 = vmatmul.mubr.msk.f32.gmra.mrb[2].mxu0 %vm1011_vm1, %v1035_v17  ;;  %v1239_v4 = vld [vmem:[#allocation2 + $0x32] ss:$2 sm:$0xff]  ;;  %v1348_v26 = vld [vmem:[#allocation2 + $0x23] ss:$2 sm:$0xff]  ;;  %v1350_v42 = vld [vmem:[#allocation2 + $0x33] ss:$2 sm:$0xff] }
 0x12a   : > { %2277 = vmatprep.mubr.msk.f32.mxu0 %vm1011_vm1, %v1020_v18 }
 0x12d   : > { %2278 = vmatmul.mubr.msk.f32.vlgmr.msra.gmra.mrb[0].mxu0 %vm1011_vm1, %v1022_v8 }
 0x12e   : > { %2284 = vmatpush3.msra.mxu0 %v2140_v1  ;;  %2280 = vmatprep.mubr.msk.f32.mxu0 %vm1011_vm1, %v1024_v10  ;;  %v1454_v1 = vld [vmem:[%s3256_s4] sm:$0xff]  ;;  %v1487_v10 = vld [vmem:[%s3257_s5 + $0x10] sm:$0xff] }
 0x12f   : > { %2291 = vmatprep.subr.mxu0 %v2145_v5 }
 0x131   : > { %2281 = vmatmul.mubr.msk.f32.gmra.mrb[2].mxu0 %vm1011_vm1, %v1026_v6  ;;  %v1488_v6 = vld [vmem:[%s3257_s5 + $0x18] sm:$0xff] }
 0x132   : > { %2285 = vmatprep.mubr.msk.f32.mxu0 %vm1011_vm1, %v1233_v24  ;;  %v2430_v24 = vpack.c.bf16 %v1488_v6, %v1487_v10 }
 0x135   : > { %2286 = vmatmul.mubr.msk.f32.vlgmr.msra.gmra.mrb[0].mxu0 %vm1011_vm1, %v1235_v7 }
 0x136   : > { %2292 = vmatpush3.msra.mxu0 %v2145_v5  ;;  %2288 = vmatprep.mubr.msk.f32.mxu0 %vm1011_vm1, %v1237_v11  ;;  %v1489_v11 = vld [vmem:[%s3257_s5 + $0x20] sm:$0xff] }
 0x137   : > { %2475 = vmatprep.subr.bf16.mxu0 %v2474_v29 }
 0x139   : > { %2289 = vmatmul.mubr.msk.f32.gmra.mrb[2].mxu0 %vm1011_vm1, %v1239_v4  ;;  %v1490_v4 = vld [vmem:[%s3257_s5 + $0x28] sm:$0xff] }
 0x13a   : > { %2293 = vmatprep.mubr.msk.f32.mxu0 %vm1011_vm1, %v1344_v19 }
 0x13d   : > { %2294 = vmatmul.mubr.msk.f32.vlgmr.msra.gmra.mrb[0].mxu0 %vm1011_vm1, %v1346_v20  ;;  %v2434_v20 = vpack.c.bf16 %v1490_v4, %v1489_v11 }
 0x13e   : > { %2296 = vmatprep.mubr.msk.f32.mxu0 %vm1011_vm1, %v1348_v26  ;;  %2477 = vmatpush3.bf16.msra.mxu0 %v2474_v29  ;;  %v1491_v26 = vld [vmem:[%s3257_s5 + $0x30] sm:$0xff] }
 0x13f   : > { %2479 = vmatprep.subr.bf16.mxu0 %v2478_v41  ;;  %v2174_v29 = vld [vmem:[%s3257_s5 + $0xd0] sm:$0xff] }
 0x141   : > { %2297 = vmatmul.mubr.msk.f32.gmra.mrb[2].mxu0 %vm1011_vm1, %v1350_v42  ;;  %v1492_v42 = vld [vmem:[%s3257_s5 + $0x38] sm:$0xff] }
 0x142   : > { %2481 = vmatpush3.bf16.msra.mxu0 %v2478_v41  ;;  %v2438_v43 = vpack.c.bf16 %v1492_v42, %v1491_v26  ;;  %v2462_v41 = vpack.c.bf16 %v2175_v30, %v2174_v29 }
 0x143   : > { %2483 = vmatprep.subr.bf16.mxu0 %v2482_v46 }
 0x146   : > { %2485 = vmatpush3.bf16.msra.mxu0 %v2482_v46  ;;  %v2177_v46 = vld [vmem:[%s3257_s5 + $0xe8] sm:$0xff] }
 0x147   : > { %2487 = vmatprep.subr.bf16.mxu0 %v2486_v50  ;;  %v2466_v37 = vpack.c.bf16 %v2177_v46, %v2176_v45 }
 0x14a   : > { %2489 = vmatpush3.bf16.msra.mxu0 %v2486_v50  ;;  %v2178_v50 = vld [vmem:[%s3257_s5 + $0xf0] sm:$0xff] }
 0x14b   : > { %2491 = vmatprep.subr.bf16.mxu0 %v2490_v38  ;;  %v2470_v28 = vpack.c.bf16 %v2179_v31, %v2178_v50 }
 0x14e   : > { %2493 = vmatpush3.bf16.msra.mxu0 %v2490_v38 }
 0x14f   : > { %2495 = vmatprep.subr.bf16.mxu0 %v2494_v53 }
 0x152   : > { %2497 = vmatpush3.bf16.msra.mxu0 %v2494_v53  ;;  %v2498_v53 = vpack.c.bf16 %v1883_v52, %v1882_v51 }
 0x154   : > { %2499 = vmatprep.subr.bf16.mxu0 %v2498_v53 }
 0x156   : > { %2501 = vmatpush3.bf16.msra.mxu0 %v2498_v53 }
 0x210   : > { %v2295_v35 = vpop.f32.mrb[0].mxu0 }
 0x211   : > { %v1459_v54 = vadd.f32 %v2295_v35, %v1455_v0  ;;  %v1431_v55 = vpop.f32.mrb[1].mxu0  ;;  %v1884_v0 = vld [vmem:[%s3259_s7 + $0x70] sm:$0xff] }
 0x212   : > { %v1458_v56 = vadd.f32 %v1454_v1, %v1431_v55  ;;  %v1885_v1 = vld [vmem:[%s3259_s7 + $0x78] sm:$0xff]  ;;  %v1860_v55 = vld [vmem:[%s3258_s6] sm:$0xff] }
 0x213   : > { %vm1463_vm11 = vcmp.gt.f32.partialorder %v1459_v54, 0.0  ;;  %v1467_v9 = vmul.f32 0.01, %v1459_v54  ;;  %v2502_v35 = vpack.c.bf16 %v1885_v1, %v1884_v0 }
 0x214   : > { %vm1462_vm13 = vcmp.gt.f32.partialorder %v1458_v56, 0.0  ;;  %v1466_v32 = vmul.f32 0.01, %v1458_v56  ;;  %v2298_v3 = vpop.f32.mrb[2].mxu0 }
 0x215   : > { %v1471_v2 = vsel %vm1463_vm11, %v1459_v54, %v1467_v9  ;;  %v1461_v62 = vadd.f32 %v2298_v3, %v1457_v57  ;;  %v1441_v47 = vpop.f32.mrb[3].mxu0  ;;  %2503 = vmatprep.subr.bf16.mxu0 %v2502_v35  ;;  %v1861_v54 = vld [vmem:[%s3258_s6 + $0x8] sm:$0xff] }
 0x216   : > { %1479 = vst.msk [vmem:[#allocation3 + $0x9] sm:$0xff] %vm1477_vm12, %v1471_v2  ;;  %v1470_v63 = vsel %vm1462_vm13, %v1458_v56, %v1466_v32  ;;  %v1460_v48 = vadd.f32 %v1456_v58, %v1441_v47  ;;  %2505 = vmatpush3.bf16.msra.mxu0 %v2502_v35  ;;  %v2182_v47 = vld [vmem:[%s3260_s8] ss:$0 sm:$0xff] }
 0x217   : > { %1478 = vst.msk [vmem:[#allocation3 + $0x1] sm:$0xff] %vm1477_vm12, %v1470_v63  ;;  %vm1465_vm14 = vcmp.gt.f32.partialorder %v1461_v62, 0.0  ;;  %v1469_v15 = vmul.f32 0.01, %v1461_v62 }
 0x218   : > { %vm1464_vm15 = vcmp.gt.f32.partialorder %v1460_v48, 0.0  ;;  %v1468_v17 = vmul.f32 0.01, %v1460_v48 }
 0x219   : > { %v1473_v18 = vsel %vm1465_vm14, %v1461_v62, %v1469_v15 }
 0x21a   : > { %1481 = vst.msk [vmem:[#allocation3 + $0x19] sm:$0xff] %vm1477_vm12, %v1473_v18  ;;  %v1472_v8 = vsel %vm1464_vm15, %v1460_v48, %v1468_v17 }
 0x21b   : > { %1480 = vst.msk [vmem:[#allocation3 + $0x11] sm:$0xff] %vm1477_vm12, %v1472_v8 }
 0x21e   : > { %v1494_v5 = vld [vmem:[#allocation3 + $0x1] ss:$2 sm:$0xff]  ;;  %v1482_v19 = vld [vmem:[#allocation3] ss:$2 sm:$0xff] }
 0x21f   : > { %2315 = vmatprep.mubr.msk.f32.mxu1 %vm1477_vm12, %v1494_v5  ;;  %v1669_v60 = vld [vmem:[#allocation3 + $0x2] ss:$2 sm:$0xff] }
 0x222   : > { %v1496_v7 = vld [vmem:[#allocation3 + $0x11] ss:$2 sm:$0xff]  ;;  %v1484_v16 = vld [vmem:[#allocation3 + $0x10] ss:$2 sm:$0xff] }
 0x223   : > { %2316 = vmatmul.mubr.msk.f32.vlgmr.msra.gmra.mrb[0].mxu1 %vm1477_vm12, %v1496_v7  ;;  %v1671_v44 = vld [vmem:[#allocation3 + $0x12] ss:$2 sm:$0xff]  ;;  %v1765_v49 = vld [vmem:[#allocation3 + $0x3] ss:$2 sm:$0xff]  ;;  %v1767_v38 = vld [vmem:[#allocation3 + $0x13] ss:$2 sm:$0xff] }
 0x224   : > { %2429 = vmatpush3.bf16.msra.mxu1 %v3051_v39  ;;  %2334 = vmatprep.mubr.msk.f32.mxu1 %vm1477_vm12, %v1482_v19  ;;  %v2454_v39 = vpack.c.bf16 %v2169_v59, %v2168_v22 }
 0x225   : > { %2431 = vmatprep.subr.bf16.mxu1 %v2430_v24 }
 0x228   : > { %2433 = vmatpush3.bf16.msra.mxu1 %v2430_v24 }
 0x229   : > { %2435 = vmatprep.subr.bf16.mxu1 %v2434_v20 }
 0x22c   : > { %2437 = vmatpush3.bf16.msra.mxu1 %v2434_v20 }
 0x22d   : > { %2439 = vmatprep.subr.bf16.mxu1 %v2438_v43 }
 0x230   : > { %2441 = vmatpush3.bf16.msra.mxu1 %v2438_v43 }
 0x231   : > { %2443 = vmatprep.subr.bf16.mxu1 %v2442_v14 }
 0x233   : > { %2335 = vmatmul.mubr.msk.f32.vlgmr.msra.gmra.mrb[0].mxu1 %vm1477_vm12, %v1484_v16 }
 0x234   : > { %2445 = vmatpush3.bf16.msra.mxu1 %v2442_v14  ;;  %2353 = vmatprep.mubr.msk.f32.mxu1 %vm1477_vm12, %v1669_v60 }
 0x235   : > { %2447 = vmatprep.subr.bf16.mxu1 %v2446_v21 }
 0x238   : > { %2449 = vmatpush3.bf16.msra.mxu1 %v2446_v21 }
 0x239   : > { %2451 = vmatprep.subr.bf16.mxu1 %v2450_v61 }
 0x23c   : > { %2453 = vmatpush3.bf16.msra.mxu1 %v2450_v61 }
 0x23d   : > { %2455 = vmatprep.subr.bf16.mxu1 %v2454_v39 }
 0x240   : > { %2457 = vmatpush3.bf16.msra.mxu1 %v2454_v39 }
 0x241   : > { %2459 = vmatprep.subr.bf16.mxu1 %v2458_v25 }
 0x243   : > { %2354 = vmatmul.mubr.msk.f32.vlgmr.msra.gmra.mrb[0].mxu1 %vm1477_vm12, %v1671_v44 }
 0x244   : > { %2461 = vmatpush3.bf16.msra.mxu1 %v2458_v25  ;;  %2372 = vmatprep.mubr.msk.f32.mxu1 %vm1477_vm12, %v1765_v49 }
 0x245   : > { %2463 = vmatprep.subr.bf16.mxu1 %v2462_v41 }
 0x248   : > { %2465 = vmatpush3.bf16.msra.mxu1 %v2462_v41 }
 0x249   : > { %2467 = vmatprep.subr.bf16.mxu1 %v2466_v37 }
 0x24c   : > { %2469 = vmatpush3.bf16.msra.mxu1 %v2466_v37 }
 0x24d   : > { %2471 = vmatprep.subr.bf16.mxu1 %v2470_v28 }
 0x250   : > { %2473 = vmatpush3.bf16.msra.mxu1 %v2470_v28 }
 0x253   : > { %2373 = vmatmul.mubr.msk.f32.vlgmr.msra.gmra.mrb[0].mxu1 %vm1477_vm12, %v1767_v38 }
 0x326   : > { %v2374_v56 = vpop.f32.mrb[0].mxu1 }
 0x327   : > { %v1863_v57 = vadd.f32 %v2374_v56, %v1861_v54  ;;  %v1849_v9 = vpop.f32.mrb[1].mxu1 }
 0x328   : > { %v1862_v58 = vadd.f32 %v1860_v55, %v1849_v9 }
 0x329   : > { %v1867_v32 = vmul.f32 0.01, %v1863_v57  ;;  %vm1865_vm0 = vcmp.gt.f32.partialorder %v1863_v57, 0.0 }
 0x32a   : > { %v1866_v3 = vmul.f32 0.01, %v1862_v58  ;;  %vm1864_vm1 = vcmp.gt.f32.partialorder %v1862_v58, 0.0 }
 0x32b   : > { %v1869_v62 = vsel %vm1865_vm0, %v1863_v57, %v1867_v32 }
 0x32c   : > { %v1868_v2 = vsel %vm1864_vm1, %v1862_v58, %v1866_v3 }
 0x32d   : > { %2407 = vmatprep.mubr.f32.mxu0 %v1868_v2 }
 0x32e   : > { %2408 = vmatmul.mubr.f32.vlgmr.msra.gmra.mrb[4].mxu0 %v1869_v62 }
 0x401   : > { %v2409_v63 = vpop.f32.mrb[4].mxu0 }
 0x402   : > { %v1965_v48 = vadd.f32 %v2409_v63, %v2182_v47  ;;  %v1959_v15 = vpop.f32.mrb[5].mxu0 }
 0x403   : > { %v1960_v17 = vadd.f32 %v2182_v47, %v1959_v15 }
 0x404   : > { %1969 = vst [vmem:[%s325_s17 + $0x8] sm:$0xff] %v1965_v48 }
 0x405   : > { %1968 = vst [vmem:[%s325_s17] sm:$0xff] %v1960_v17 }
 0x406   : > { %2583 = shalt.err (!%p2580_p3)
}
 0x407   : > { %s2584_s28 = scalar_lea.hbm %s3209_s25, 256  ;;  %s2588_s22 = scalar_lea.hbm %s3261_s9, 512 }
 0x408   : > { %p2585_p4 = scmp.ne.s32.totalorder %s3209_s25, %s2584_s28  ;;  %p2589_p9 = scmp.lt.u32.totalorder %s3209_s25, %s3261_s9 }
 0x409   : > { %p2590_p10 = scmp.lt.u32.totalorder %s2588_s22, %s2584_s28  ;;  %p2592_p12 = scmp.lt.u32.totalorder %s2584_s28, %s3209_s25 }
 0x40a   : > { %p2586_p7 = pnand %p2585_p4, %p2727_p5 }
 0x40b   : > { %p2591_p11 = por %p2590_p10, %p2589_p9 }
 0x40c   : > { %p2587_p8 = pneg %p2586_p7 }
 0x40d   : > { %p2593_p13 = por %p2592_p12, %p2591_p11 }
 0x40f   : > { %p2594_p0 = pnand %p2593_p13, %p2587_p8 }
 0x411   : > { %2597 = shalt.err (!%p2594_p0)
}
 0x412   : > { %s2637_s27 = smov 128   ;;  %s2638_s13 = smov 8  }
 0x413   : > { %2525 = dma.vmem_to_hbm [thread:$0]  (%p2727_p5), %s3204_s21, 256, %s3209_s25, %s3211_s26, %s2637_s27, %s2637_s27, %s2638_s13  }
 0x414 PF: > { %p2531_p1 = scmp.ge.s32.totalorder %s2632_s12, 2  ;;  %s1999_s29 = sand.u32 1, %s2620_s30  }
 0x415   : > { %s2000_s14 = scalar_lea.sflag [#allocation5], %s1999_s29 }
 0x416   : > { %p2528_p2 = pnand %p2531_p1, %p2731_p6 }
 0x418   : > { %2615 = dma.done.wait (!%p2528_p2), %s2000_s14, 256  }
 0x419   : > { %2617 = vsyncadd (!%p2528_p2), %s2000_s14, 4294967040  ;;  %p19_p3 = scmp.ge.s32.totalorder %s2714_s15, 4   ;;  %s3264_s30 = smov %s2624_s10 }
 0x41a   : > { %s3265_s10 = smov %s2628_s11  ;;  %s3266_s11 = smov %s2725_s18 }
 0x41b   : > { %s3267_s12 = smov %s2714_s15  ;;  %21 = sbr.rel (!%p19_p3) target bundleno = 3 (0x3), region = 189 }
 0x422   :  { %2005 = vsyncpa [#allocation5], 1 }
 0x423   :  { %2007 = vsyncpa [#allocation5 + $0x1], 1 }

</bundles_post_ra>
